<compile_context>
chip_gen: v5e
topology: v5e:2x2
jax: 0.10.0
libtpu: 0.0.40
codegen_flags: <defaults>
</compile_context>

<pallas_src>
import jax
import jax.numpy as jnp
from jax.experimental import pallas as pl
from jax.experimental.pallas import tpu as pltpu


def _round_up(v, m):
    return (v + m - 1) // m * m


def _make_conv_kernel(wp, tile_l, sub_l, cout, negative_slope, apply_act):
    """3x3 conv (+ folded BN bias, + optional LeakyReLU) on one flat spatial tile."""
    n_sub = tile_l // sub_l
    taps = [(dh, dw) for dh in range(3) for dw in range(3)]

    def kernel(x_ref, w_ref, b_ref, o_ref):
        # x_ref: (Cin, tile_l + halo)  overlapping window of the flattened padded image
        # w_ref: (9, Cout, Cin)        folded conv+BN weights (VMEM resident)
        # b_ref: (Cout, 1)             folded bias
        # o_ref: (Cout, tile_l)        lane-dense output tile
        bias = b_ref[...]
        for j in range(n_sub):
            base = j * sub_l
            acc = jnp.zeros((cout, sub_l), dtype=jnp.float32)
            for k, (dh, dw) in enumerate(taps):
                s = dh * wp + dw                                   # static flat tap shift
                xs = x_ref[:, base + s:base + s + sub_l]           # (Cin, sub_l) static slice
                acc = acc + jnp.dot(w_ref[k], xs,
                                    preferred_element_type=jnp.float32)
            acc = acc + bias
            if apply_act:
                acc = jnp.where(acc >= 0, acc, negative_slope * acc)
            o_ref[:, base:base + sub_l] = acc.astype(o_ref.dtype)

    return kernel


def conv3x3_folded(x, w_taps, bias, *, apply_act, negative_slope=0.01, tile_l=None):
    """3x3, stride-1, pad-1 conv with folded scale/bias (+ optional LeakyReLU).

    x      : (N, Cin, H, W) f32, NCHW
    w_taps : (9, Cout, Cin) f32, w_taps[dh*3 + dw] == W[:, :, dh, dw]
    bias   : (Cout,)        f32
    returns (N, Cout, H, W) f32
    """
    N, Cin, H, W = x.shape
    Cout = w_taps.shape[1]
    Wp, Hp = W + 2, H + 2
    halo = 2 * Wp + 2                      # max flat tap offset (dh*Wp + dw)
    l_out = H * Wp                         # flat output length per image (padded-width layout)

    # Lane tile: multiple of 128 (lane-dense stores), >= halo, <= whole image.
    if tile_l is None:
        tile_l = 2048
    tile_l = _round_up(int(tile_l), 128)
    tile_l = min(tile_l, _round_up(l_out, 128))
    tile_l = max(tile_l, _round_up(halo, 128))
    n_tiles = -(-l_out // tile_l)
    l_tot = n_tiles * tile_l
    lw = tile_l + halo

    # Sub-chunk width so the f32 accumulator stays register-resident across the 9 taps.
    sub_l = tile_l
    for cand in (512, 256, 128):
        if tile_l % cand == 0:
            sub_l = cand
            break

    # ---- wrapper-side layout prep (cheap pad/reshape/concat, fuses in XLA) ----
    x_pad = jnp.pad(x, ((0, 0), (0, 0), (1, 1), (1, 1)))               # (N,Cin,Hp,Wp)
    x_flat = x_pad.reshape(N, Cin, Hp * Wp)
    x_flat = jnp.pad(x_flat, ((0, 0), (0, 0), (0, l_tot + tile_l - Hp * Wp)))
    body = x_flat[:, :, :l_tot].reshape(N, Cin, n_tiles, tile_l)
    tail = x_flat[:, :, tile_l:tile_l + l_tot].reshape(N, Cin, n_tiles, tile_l)[..., :halo]
    x_win = jnp.concatenate([body, tail], axis=-1)                     # (N,Cin,T,lw)
    x_win = jnp.moveaxis(x_win, 2, 1)                                  # (N,T,Cin,lw)

    b2 = bias.reshape(Cout, 1).astype(jnp.float32)

    kernel = _make_conv_kernel(Wp, tile_l, sub_l, Cout, negative_slope, apply_act)

    flops = 2 * N * l_tot * Cout * Cin * 9
    bytes_accessed = int(4 * (x_win.size + w_taps.size + b2.size + N * Cout * l_tot))

    out_flat = pl.pallas_call(
        kernel,
        out_shape=jax.ShapeDtypeStruct((N, Cout, l_tot), x.dtype),
        grid=(N, n_tiles),
        in_specs=[
            pl.BlockSpec((None, None, Cin, lw), lambda n, t: (n, t, 0, 0)),
            pl.BlockSpec((9, Cout, Cin), lambda n, t: (0, 0, 0)),
            pl.BlockSpec((Cout, 1), lambda n, t: (0, 0)),
        ],
        out_specs=pl.BlockSpec((None, Cout, tile_l), lambda n, t: (n, 0, t)),
        compiler_params=pltpu.CompilerParams(
            dimension_semantics=("parallel", "parallel")),
        cost_estimate=pl.CostEstimate(
            flops=flops, transcendentals=0, bytes_accessed=bytes_accessed),
    )(x_win, w_taps, b2)

    # Drop padded-width garbage columns / tile padding -> (N, Cout, H, W).
    return out_flat[:, :, :l_out].reshape(N, Cout, H, Wp)[:, :, :, :W]


def _fold_bn(w, gamma, beta, mean, var, eps=1e-5):
    """Fold eval-mode BatchNorm into a bias-free conv: returns (w_folded, bias)."""
    scale = gamma / jnp.sqrt(var + eps)                    # (Cout,)
    return w * scale[:, None, None, None], beta - mean * scale


def _to_taps(w):
    """(Cout, Cin, 3, 3) -> (9, Cout, Cin), tap index k = dh*3 + dw."""
    cout, cin = w.shape[0], w.shape[1]
    return jnp.transpose(w, (2, 3, 0, 1)).reshape(9, cout, cin)


def basic_stem_forward(x, params, tile_l=None):
    """BasicStem forward: (conv3x3 + BN + LeakyReLU) x2 -> conv3x3."""
    # TODO(synk): BatchNorm is folded in inference mode (running stats); training-mode
    # batch statistics (global N*H*W reduction + running-stat update) is not done in-kernel.
    w1, b1 = _fold_bn(params["conv1_w"], *params["bn1"])
    w2, b2 = _fold_bn(params["conv2_w"], *params["bn2"])
    w3 = params["conv3_w"]
    b3 = jnp.zeros((w3.shape[0],), dtype=x.dtype)

    h = conv3x3_folded(x, _to_taps(w1), b1, apply_act=True, tile_l=tile_l)
    h = conv3x3_folded(h, _to_taps(w2), b2, apply_act=True, tile_l=tile_l)
    return conv3x3_folded(h, _to_taps(w3), b3, apply_act=False, tile_l=tile_l)


def stem_reference(x, params):
    """Pure-JAX reference for the PyTorch module (eval-mode BN)."""
    eps = 1e-5

    def conv(h, w):
        return jax.lax.conv_general_dilated(
            h, w, window_strides=(1, 1), padding=((1, 1), (1, 1)),
            dimension_numbers=("NCHW", "OIHW", "NCHW"),
            precision=jax.lax.Precision.HIGHEST)

    def bn(h, g, b, m, v):
        return (h - m[None, :, None, None]) / jnp.sqrt(v[None, :, None, None] + eps) \
            * g[None, :, None, None] + b[None, :, None, None]

    def act(h):
        return jnp.where(h >= 0, h, 0.01 * h)

    h = act(bn(conv(x, params["conv1_w"]), *params["bn1"]))
    h = act(bn(conv(h, params["conv2_w"]), *params["bn2"]))
    return conv(h, params["conv3_w"])


if __name__ == "__main__":
    key = jax.random.PRNGKey(0)
    ks = jax.random.split(key, 12)

    N, Cin, H, W = 2, 3, 16, 16     # module defaults: in_ch=3, out_ch=64
    Cout = 64
    Ch = Cout // 2                  # hidden = 32

    x = jax.random.normal(ks[0], (N, Cin, H, W), dtype=jnp.float32)
    params = {
        "conv1_w": jax.random.normal(ks[1], (Ch, Cin, 3, 3), jnp.float32) * 0.2,
        "conv2_w": jax.random.normal(ks[2], (Ch, Ch, 3, 3), jnp.float32) * 0.1,
        "conv3_w": jax.random.normal(ks[3], (Cout, Ch, 3, 3), jnp.float32) * 0.1,
        "bn1": (1.0 + 0.1 * jax.random.normal(ks[4], (Ch,), jnp.float32),
                0.1 * jax.random.normal(ks[5], (Ch,), jnp.float32),
                0.1 * jax.random.normal(ks[6], (Ch,), jnp.float32),
                1.0 + 0.5 * jax.nn.sigmoid(jax.random.normal(ks[7], (Ch,), jnp.float32))),
        "bn2": (1.0 + 0.1 * jax.random.normal(ks[8], (Ch,), jnp.float32),
                0.1 * jax.random.normal(ks[9], (Ch,), jnp.float32),
                0.1 * jax.random.normal(ks[10], (Ch,), jnp.float32),
                1.0 + 0.5 * jax.nn.sigmoid(jax.random.normal(ks[11], (Ch,), jnp.float32))),
    }

    fwd = jax.jit(basic_stem_forward, static_argnames=("tile_l",))
    # tile_l=128 exercises the multi-tile + halo path even at this small spatial size.
    y = fwd(x, params, tile_l=128)
    jax.block_until_ready(y)

    y_ref = stem_reference(x, params)
    assert y.shape == (N, Cout, H, W)
    assert jnp.allclose(y, y_ref, atol=1e-2, rtol=1e-2), \
        float(jnp.max(jnp.abs(y - y_ref)))

    print("KERNEL_OK")
</pallas_src>

<mosaic_0001>
module attributes {stable_mosaic.version = 11 : i64} {
  func.func @kernel(%arg0: i32, %arg1: i32, %arg2: memref<1x1x3x166xf32, #tpu.memory_space<vmem>>, %arg3: memref<9x32x3xf32, #tpu.memory_space<vmem>>, %arg4: memref<32x1xf32, #tpu.memory_space<vmem>>, %arg5: memref<1x32x128xf32, #tpu.memory_space<vmem>>) attributes {dimension_semantics = [#tpu.dimension_semantics<parallel>, #tpu.dimension_semantics<parallel>], iteration_bounds = array<i64: 2, 3>, scalar_prefetch = 0 : i64, scratch_operands = 0 : i64, tpu.core_type = #tpu.core_type<tc>, window_params = [{transform_indices = @transform_0, window_bounds = array<i64: 1, 1, 3, 166>}, {pipeline_mode = #tpu.pipeline_mode<synchronous>, transform_indices = @transform_1, window_bounds = array<i64: 9, 32, 3>}, {pipeline_mode = #tpu.pipeline_mode<synchronous>, transform_indices = @transform_2, window_bounds = array<i64: 32, 1>}, {transform_indices = @transform_3, window_bounds = array<i64: 1, 32, 128>}]} {
    %c0 = arith.constant 0 : index
    %c0_0 = arith.constant 0 : index
    %0 = vector.load %arg4[%c0, %c0_0] : memref<32x1xf32, #tpu.memory_space<vmem>>, vector<32x1xf32>
    %cst = arith.constant 0.000000e+00 : f32
    %1 = vector.broadcast %cst : f32 to vector<32x128xf32>
    %c0_1 = arith.constant 0 : index
    %c0_2 = arith.constant 0 : index
    %c0_3 = arith.constant 0 : index
    %c0_4 = arith.constant 0 : index
    %2 = vector.load %arg2[%c0_1, %c0_2, %c0_3, %c0_4] : memref<1x1x3x166xf32, #tpu.memory_space<vmem>>, vector<1x1x3x128xf32>
    %3 = vector.shape_cast %2 : vector<1x1x3x128xf32> to vector<3x128xf32>
    %c0_5 = arith.constant 0 : index
    %c0_6 = arith.constant 0 : index
    %c0_7 = arith.constant 0 : index
    %4 = vector.load %arg3[%c0_5, %c0_6, %c0_7] : memref<9x32x3xf32, #tpu.memory_space<vmem>>, vector<1x32x3xf32>
    %5 = vector.shape_cast %4 : vector<1x32x3xf32> to vector<32x3xf32>
    %cst_8 = arith.constant dense<0.000000e+00> : vector<32x128xf32>
    %6 = tpu.matmul %5, %3, %cst_8 {dimension_numbers = #tpu.dot_dimension_numbers<[1], [0], [0], [1], [0, 0, 1, 1], [], []>} : vector<32x3xf32>, vector<3x128xf32>, vector<32x128xf32> -> vector<32x128xf32>
    %7 = arith.addf %1, %6 : vector<32x128xf32>
    %c0_9 = arith.constant 0 : index
    %c0_10 = arith.constant 0 : index
    %c0_11 = arith.constant 0 : index
    %c1 = arith.constant 1 : index
    %8 = vector.load %arg2[%c0_9, %c0_10, %c0_11, %c1] : memref<1x1x3x166xf32, #tpu.memory_space<vmem>>, vector<1x1x3x128xf32>
    %9 = vector.shape_cast %8 : vector<1x1x3x128xf32> to vector<3x128xf32>
    %c1_12 = arith.constant 1 : index
    %c0_13 = arith.constant 0 : index
    %c0_14 = arith.constant 0 : index
    %10 = vector.load %arg3[%c1_12, %c0_13, %c0_14] : memref<9x32x3xf32, #tpu.memory_space<vmem>>, vector<1x32x3xf32>
    %11 = vector.shape_cast %10 : vector<1x32x3xf32> to vector<32x3xf32>
    %cst_15 = arith.constant dense<0.000000e+00> : vector<32x128xf32>
    %12 = tpu.matmul %11, %9, %cst_15 {dimension_numbers = #tpu.dot_dimension_numbers<[1], [0], [0], [1], [0, 0, 1, 1], [], []>} : vector<32x3xf32>, vector<3x128xf32>, vector<32x128xf32> -> vector<32x128xf32>
    %13 = arith.addf %7, %12 : vector<32x128xf32>
    %c0_16 = arith.constant 0 : index
    %c0_17 = arith.constant 0 : index
    %c0_18 = arith.constant 0 : index
    %c2 = arith.constant 2 : index
    %14 = vector.load %arg2[%c0_16, %c0_17, %c0_18, %c2] : memref<1x1x3x166xf32, #tpu.memory_space<vmem>>, vector<1x1x3x128xf32>
    %15 = vector.shape_cast %14 : vector<1x1x3x128xf32> to vector<3x128xf32>
    %c2_19 = arith.constant 2 : index
    %c0_20 = arith.constant 0 : index
    %c0_21 = arith.constant 0 : index
    %16 = vector.load %arg3[%c2_19, %c0_20, %c0_21] : memref<9x32x3xf32, #tpu.memory_space<vmem>>, vector<1x32x3xf32>
    %17 = vector.shape_cast %16 : vector<1x32x3xf32> to vector<32x3xf32>
    %cst_22 = arith.constant dense<0.000000e+00> : vector<32x128xf32>
    %18 = tpu.matmul %17, %15, %cst_22 {dimension_numbers = #tpu.dot_dimension_numbers<[1], [0], [0], [1], [0, 0, 1, 1], [], []>} : vector<32x3xf32>, vector<3x128xf32>, vector<32x128xf32> -> vector<32x128xf32>
    %19 = arith.addf %13, %18 : vector<32x128xf32>
    %c0_23 = arith.constant 0 : index
    %c0_24 = arith.constant 0 : index
    %c0_25 = arith.constant 0 : index
    %c18 = arith.constant 18 : index
    %20 = vector.load %arg2[%c0_23, %c0_24, %c0_25, %c18] : memref<1x1x3x166xf32, #tpu.memory_space<vmem>>, vector<1x1x3x128xf32>
    %21 = vector.shape_cast %20 : vector<1x1x3x128xf32> to vector<3x128xf32>
    %c3 = arith.constant 3 : index
    %c0_26 = arith.constant 0 : index
    %c0_27 = arith.constant 0 : index
    %22 = vector.load %arg3[%c3, %c0_26, %c0_27] : memref<9x32x3xf32, #tpu.memory_space<vmem>>, vector<1x32x3xf32>
    %23 = vector.shape_cast %22 : vector<1x32x3xf32> to vector<32x3xf32>
    %cst_28 = arith.constant dense<0.000000e+00> : vector<32x128xf32>
    %24 = tpu.matmul %23, %21, %cst_28 {dimension_numbers = #tpu.dot_dimension_numbers<[1], [0], [0], [1], [0, 0, 1, 1], [], []>} : vector<32x3xf32>, vector<3x128xf32>, vector<32x128xf32> -> vector<32x128xf32>
    %25 = arith.addf %19, %24 : vector<32x128xf32>
    %c0_29 = arith.constant 0 : index
    %c0_30 = arith.constant 0 : index
    %c0_31 = arith.constant 0 : index
    %c19 = arith.constant 19 : index
    %26 = vector.load %arg2[%c0_29, %c0_30, %c0_31, %c19] : memref<1x1x3x166xf32, #tpu.memory_space<vmem>>, vector<1x1x3x128xf32>
    %27 = vector.shape_cast %26 : vector<1x1x3x128xf32> to vector<3x128xf32>
    %c4 = arith.constant 4 : index
    %c0_32 = arith.constant 0 : index
    %c0_33 = arith.constant 0 : index
    %28 = vector.load %arg3[%c4, %c0_32, %c0_33] : memref<9x32x3xf32, #tpu.memory_space<vmem>>, vector<1x32x3xf32>
    %29 = vector.shape_cast %28 : vector<1x32x3xf32> to vector<32x3xf32>
    %cst_34 = arith.constant dense<0.000000e+00> : vector<32x128xf32>
    %30 = tpu.matmul %29, %27, %cst_34 {dimension_numbers = #tpu.dot_dimension_numbers<[1], [0], [0], [1], [0, 0, 1, 1], [], []>} : vector<32x3xf32>, vector<3x128xf32>, vector<32x128xf32> -> vector<32x128xf32>
    %31 = arith.addf %25, %30 : vector<32x128xf32>
    %c0_35 = arith.constant 0 : index
    %c0_36 = arith.constant 0 : index
    %c0_37 = arith.constant 0 : index
    %c20 = arith.constant 20 : index
    %32 = vector.load %arg2[%c0_35, %c0_36, %c0_37, %c20] : memref<1x1x3x166xf32, #tpu.memory_space<vmem>>, vector<1x1x3x128xf32>
    %33 = vector.shape_cast %32 : vector<1x1x3x128xf32> to vector<3x128xf32>
    %c5 = arith.constant 5 : index
    %c0_38 = arith.constant 0 : index
    %c0_39 = arith.constant 0 : index
    %34 = vector.load %arg3[%c5, %c0_38, %c0_39] : memref<9x32x3xf32, #tpu.memory_space<vmem>>, vector<1x32x3xf32>
    %35 = vector.shape_cast %34 : vector<1x32x3xf32> to vector<32x3xf32>
    %cst_40 = arith.constant dense<0.000000e+00> : vector<32x128xf32>
    %36 = tpu.matmul %35, %33, %cst_40 {dimension_numbers = #tpu.dot_dimension_numbers<[1], [0], [0], [1], [0, 0, 1, 1], [], []>} : vector<32x3xf32>, vector<3x128xf32>, vector<32x128xf32> -> vector<32x128xf32>
    %37 = arith.addf %31, %36 : vector<32x128xf32>
    %c0_41 = arith.constant 0 : index
    %c0_42 = arith.constant 0 : index
    %c0_43 = arith.constant 0 : index
    %c36 = arith.constant 36 : index
    %38 = vector.load %arg2[%c0_41, %c0_42, %c0_43, %c36] : memref<1x1x3x166xf32, #tpu.memory_space<vmem>>, vector<1x1x3x128xf32>
    %39 = vector.shape_cast %38 : vector<1x1x3x128xf32> to vector<3x128xf32>
    %c6 = arith.constant 6 : index
    %c0_44 = arith.constant 0 : index
    %c0_45 = arith.constant 0 : index
    %40 = vector.load %arg3[%c6, %c0_44, %c0_45] : memref<9x32x3xf32, #tpu.memory_space<vmem>>, vector<1x32x3xf32>
    %41 = vector.shape_cast %40 : vector<1x32x3xf32> to vector<32x3xf32>
    %cst_46 = arith.constant dense<0.000000e+00> : vector<32x128xf32>
    %42 = tpu.matmul %41, %39, %cst_46 {dimension_numbers = #tpu.dot_dimension_numbers<[1], [0], [0], [1], [0, 0, 1, 1], [], []>} : vector<32x3xf32>, vector<3x128xf32>, vector<32x128xf32> -> vector<32x128xf32>
    %43 = arith.addf %37, %42 : vector<32x128xf32>
    %c0_47 = arith.constant 0 : index
    %c0_48 = arith.constant 0 : index
    %c0_49 = arith.constant 0 : index
    %c37 = arith.constant 37 : index
    %44 = vector.load %arg2[%c0_47, %c0_48, %c0_49, %c37] : memref<1x1x3x166xf32, #tpu.memory_space<vmem>>, vector<1x1x3x128xf32>
    %45 = vector.shape_cast %44 : vector<1x1x3x128xf32> to vector<3x128xf32>
    %c7 = arith.constant 7 : index
    %c0_50 = arith.constant 0 : index
    %c0_51 = arith.constant 0 : index
    %46 = vector.load %arg3[%c7, %c0_50, %c0_51] : memref<9x32x3xf32, #tpu.memory_space<vmem>>, vector<1x32x3xf32>
    %47 = vector.shape_cast %46 : vector<1x32x3xf32> to vector<32x3xf32>
    %cst_52 = arith.constant dense<0.000000e+00> : vector<32x128xf32>
    %48 = tpu.matmul %47, %45, %cst_52 {dimension_numbers = #tpu.dot_dimension_numbers<[1], [0], [0], [1], [0, 0, 1, 1], [], []>} : vector<32x3xf32>, vector<3x128xf32>, vector<32x128xf32> -> vector<32x128xf32>
    %49 = arith.addf %43, %48 : vector<32x128xf32>
    %c0_53 = arith.constant 0 : index
    %c0_54 = arith.constant 0 : index
    %c0_55 = arith.constant 0 : index
    %c38 = arith.constant 38 : index
    %50 = vector.load %arg2[%c0_53, %c0_54, %c0_55, %c38] : memref<1x1x3x166xf32, #tpu.memory_space<vmem>>, vector<1x1x3x128xf32>
    %51 = vector.shape_cast %50 : vector<1x1x3x128xf32> to vector<3x128xf32>
    %c8 = arith.constant 8 : index
    %c0_56 = arith.constant 0 : index
    %c0_57 = arith.constant 0 : index
    %52 = vector.load %arg3[%c8, %c0_56, %c0_57] : memref<9x32x3xf32, #tpu.memory_space<vmem>>, vector<1x32x3xf32>
    %53 = vector.shape_cast %52 : vector<1x32x3xf32> to vector<32x3xf32>
    %cst_58 = arith.constant dense<0.000000e+00> : vector<32x128xf32>
    %54 = tpu.matmul %53, %51, %cst_58 {dimension_numbers = #tpu.dot_dimension_numbers<[1], [0], [0], [1], [0, 0, 1, 1], [], []>} : vector<32x3xf32>, vector<3x128xf32>, vector<32x128xf32> -> vector<32x128xf32>
    %55 = arith.addf %49, %54 : vector<32x128xf32>
    %56 = vector.broadcast %0 : vector<32x1xf32> to vector<32x128xf32>
    %57 = arith.addf %55, %56 : vector<32x128xf32>
    %cst_59 = arith.constant 0.000000e+00 : f32
    %58 = vector.broadcast %cst_59 : f32 to vector<32x128xf32>
    %59 = arith.cmpf oge, %57, %58 : vector<32x128xf32>
    %cst_60 = arith.constant 0.00999999977 : f32
    %60 = vector.broadcast %cst_60 : f32 to vector<32x128xf32>
    %61 = arith.mulf %60, %57 : vector<32x128xf32>
    %62 = arith.select %59, %57, %61 : vector<32x128xi1>, vector<32x128xf32>
    %c0_61 = arith.constant 0 : index
    %c0_62 = arith.constant 0 : index
    %c0_63 = arith.constant 0 : index
    %63 = vector.load %arg5[%c0_61, %c0_62, %c0_63] : memref<1x32x128xf32, #tpu.memory_space<vmem>>, vector<1x32x128xf32>
    %64 = vector.shape_cast %63 : vector<1x32x128xf32> to vector<32x128xf32>
    %65 = vector.shape_cast %62 : vector<32x128xf32> to vector<1x32x128xf32>
    tpu.vector_store %arg5[%c0_61, %c0_62, %c0_63], %65 {strides = array<i32>} : memref<1x32x128xf32, #tpu.memory_space<vmem>>, vector<1x32x128xf32>,
    return
  }
  func.func @transform_0(%arg0: i32, %arg1: i32) -> (i32, i32, i32, i32) {
    %c0_i32 = arith.constant 0 : i32
    %c0_i32_0 = arith.constant 0 : i32
    %c0_i32_1 = arith.constant 0 : i32
    return %arg0, %arg1, %c0_i32, %c0_i32_0 : i32, i32, i32, i32
  }
  func.func @transform_1(%arg0: i32, %arg1: i32) -> (i32, i32, i32) {
    %c0_i32 = arith.constant 0 : i32
    %c0_i32_0 = arith.constant 0 : i32
    %c0_i32_1 = arith.constant 0 : i32
    %c0_i32_2 = arith.constant 0 : i32
    return %c0_i32, %c0_i32_0, %c0_i32_1 : i32, i32, i32
  }
  func.func @transform_2(%arg0: i32, %arg1: i32) -> (i32, i32) {
    %c0_i32 = arith.constant 0 : i32
    %c0_i32_0 = arith.constant 0 : i32
    %c0_i32_1 = arith.constant 0 : i32
    return %c0_i32, %c0_i32_0 : i32, i32
  }
  func.func @transform_3(%arg0: i32, %arg1: i32) -> (i32, i32, i32) {
    %c0_i32 = arith.constant 0 : i32
    %c0_i32_0 = arith.constant 0 : i32
    return %arg0, %c0_i32, %arg1 : i32, i32, i32
  }
}

module attributes {stable_mosaic.version = 11 : i64} {
  func.func @kernel(%arg0: i32, %arg1: i32, %arg2: memref<1x1x32x166xf32, #tpu.memory_space<vmem>>, %arg3: memref<9x32x32xf32, #tpu.memory_space<vmem>>, %arg4: memref<32x1xf32, #tpu.memory_space<vmem>>, %arg5: memref<1x32x128xf32, #tpu.memory_space<vmem>>) attributes {dimension_semantics = [#tpu.dimension_semantics<parallel>, #tpu.dimension_semantics<parallel>], iteration_bounds = array<i64: 2, 3>, scalar_prefetch = 0 : i64, scratch_operands = 0 : i64, tpu.core_type = #tpu.core_type<tc>, window_params = [{transform_indices = @transform_0, window_bounds = array<i64: 1, 1, 32, 166>}, {pipeline_mode = #tpu.pipeline_mode<synchronous>, transform_indices = @transform_1, window_bounds = array<i64: 9, 32, 32>}, {pipeline_mode = #tpu.pipeline_mode<synchronous>, transform_indices = @transform_2, window_bounds = array<i64: 32, 1>}, {transform_indices = @transform_3, window_bounds = array<i64: 1, 32, 128>}]} {
    %c0 = arith.constant 0 : index
    %c0_0 = arith.constant 0 : index
    %0 = vector.load %arg4[%c0, %c0_0] : memref<32x1xf32, #tpu.memory_space<vmem>>, vector<32x1xf32>
    %cst = arith.constant 0.000000e+00 : f32
    %1 = vector.broadcast %cst : f32 to vector<32x128xf32>
    %c0_1 = arith.constant 0 : index
    %c0_2 = arith.constant 0 : index
    %c0_3 = arith.constant 0 : index
    %c0_4 = arith.constant 0 : index
    %2 = vector.load %arg2[%c0_1, %c0_2, %c0_3, %c0_4] : memref<1x1x32x166xf32, #tpu.memory_space<vmem>>, vector<1x1x32x128xf32>
    %3 = vector.shape_cast %2 : vector<1x1x32x128xf32> to vector<32x128xf32>
    %c0_5 = arith.constant 0 : index
    %c0_6 = arith.constant 0 : index
    %c0_7 = arith.constant 0 : index
    %4 = vector.load %arg3[%c0_5, %c0_6, %c0_7] : memref<9x32x32xf32, #tpu.memory_space<vmem>>, vector<1x32x32xf32>
    %5 = vector.shape_cast %4 : vector<1x32x32xf32> to vector<32x32xf32>
    %cst_8 = arith.constant dense<0.000000e+00> : vector<32x128xf32>
    %6 = tpu.matmul %5, %3, %cst_8 {dimension_numbers = #tpu.dot_dimension_numbers<[1], [0], [0], [1], [0, 0, 1, 1], [], []>} : vector<32x32xf32>, vector<32x128xf32>, vector<32x128xf32> -> vector<32x128xf32>
    %7 = arith.addf %1, %6 : vector<32x128xf32>
    %c0_9 = arith.constant 0 : index
    %c0_10 = arith.constant 0 : index
    %c0_11 = arith.constant 0 : index
    %c1 = arith.constant 1 : index
    %8 = vector.load %arg2[%c0_9, %c0_10, %c0_11, %c1] : memref<1x1x32x166xf32, #tpu.memory_space<vmem>>, vector<1x1x32x128xf32>
    %9 = vector.shape_cast %8 : vector<1x1x32x128xf32> to vector<32x128xf32>
    %c1_12 = arith.constant 1 : index
    %c0_13 = arith.constant 0 : index
    %c0_14 = arith.constant 0 : index
    %10 = vector.load %arg3[%c1_12, %c0_13, %c0_14] : memref<9x32x32xf32, #tpu.memory_space<vmem>>, vector<1x32x32xf32>
    %11 = vector.shape_cast %10 : vector<1x32x32xf32> to vector<32x32xf32>
    %cst_15 = arith.constant dense<0.000000e+00> : vector<32x128xf32>
    %12 = tpu.matmul %11, %9, %cst_15 {dimension_numbers = #tpu.dot_dimension_numbers<[1], [0], [0], [1], [0, 0, 1, 1], [], []>} : vector<32x32xf32>, vector<32x128xf32>, vector<32x128xf32> -> vector<32x128xf32>
    %13 = arith.addf %7, %12 : vector<32x128xf32>
    %c0_16 = arith.constant 0 : index
    %c0_17 = arith.constant 0 : index
    %c0_18 = arith.constant 0 : index
    %c2 = arith.constant 2 : index
    %14 = vector.load %arg2[%c0_16, %c0_17, %c0_18, %c2] : memref<1x1x32x166xf32, #tpu.memory_space<vmem>>, vector<1x1x32x128xf32>
    %15 = vector.shape_cast %14 : vector<1x1x32x128xf32> to vector<32x128xf32>
    %c2_19 = arith.constant 2 : index
    %c0_20 = arith.constant 0 : index
    %c0_21 = arith.constant 0 : index
    %16 = vector.load %arg3[%c2_19, %c0_20, %c0_21] : memref<9x32x32xf32, #tpu.memory_space<vmem>>, vector<1x32x32xf32>
    %17 = vector.shape_cast %16 : vector<1x32x32xf32> to vector<32x32xf32>
    %cst_22 = arith.constant dense<0.000000e+00> : vector<32x128xf32>
    %18 = tpu.matmul %17, %15, %cst_22 {dimension_numbers = #tpu.dot_dimension_numbers<[1], [0], [0], [1], [0, 0, 1, 1], [], []>} : vector<32x32xf32>, vector<32x128xf32>, vector<32x128xf32> -> vector<32x128xf32>
    %19 = arith.addf %13, %18 : vector<32x128xf32>
    %c0_23 = arith.constant 0 : index
    %c0_24 = arith.constant 0 : index
    %c0_25 = arith.constant 0 : index
    %c18 = arith.constant 18 : index
    %20 = vector.load %arg2[%c0_23, %c0_24, %c0_25, %c18] : memref<1x1x32x166xf32, #tpu.memory_space<vmem>>, vector<1x1x32x128xf32>
    %21 = vector.shape_cast %20 : vector<1x1x32x128xf32> to vector<32x128xf32>
    %c3 = arith.constant 3 : index
    %c0_26 = arith.constant 0 : index
    %c0_27 = arith.constant 0 : index
    %22 = vector.load %arg3[%c3, %c0_26, %c0_27] : memref<9x32x32xf32, #tpu.memory_space<vmem>>, vector<1x32x32xf32>
    %23 = vector.shape_cast %22 : vector<1x32x32xf32> to vector<32x32xf32>
    %cst_28 = arith.constant dense<0.000000e+00> : vector<32x128xf32>
    %24 = tpu.matmul %23, %21, %cst_28 {dimension_numbers = #tpu.dot_dimension_numbers<[1], [0], [0], [1], [0, 0, 1, 1], [], []>} : vector<32x32xf32>, vector<32x128xf32>, vector<32x128xf32> -> vector<32x128xf32>
    %25 = arith.addf %19, %24 : vector<32x128xf32>
    %c0_29 = arith.constant 0 : index
    %c0_30 = arith.constant 0 : index
    %c0_31 = arith.constant 0 : index
    %c19 = arith.constant 19 : index
    %26 = vector.load %arg2[%c0_29, %c0_30, %c0_31, %c19] : memref<1x1x32x166xf32, #tpu.memory_space<vmem>>, vector<1x1x32x128xf32>
    %27 = vector.shape_cast %26 : vector<1x1x32x128xf32> to vector<32x128xf32>
    %c4 = arith.constant 4 : index
    %c0_32 = arith.constant 0 : index
    %c0_33 = arith.constant 0 : index
    %28 = vector.load %arg3[%c4, %c0_32, %c0_33] : memref<9x32x32xf32, #tpu.memory_space<vmem>>, vector<1x32x32xf32>
    %29 = vector.shape_cast %28 : vector<1x32x32xf32> to vector<32x32xf32>
    %cst_34 = arith.constant dense<0.000000e+00> : vector<32x128xf32>
    %30 = tpu.matmul %29, %27, %cst_34 {dimension_numbers = #tpu.dot_dimension_numbers<[1], [0], [0], [1], [0, 0, 1, 1], [], []>} : vector<32x32xf32>, vector<32x128xf32>, vector<32x128xf32> -> vector<32x128xf32>
    %31 = arith.addf %25, %30 : vector<32x128xf32>
    %c0_35 = arith.constant 0 : index
    %c0_36 = arith.constant 0 : index
    %c0_37 = arith.constant 0 : index
    %c20 = arith.constant 20 : index
    %32 = vector.load %arg2[%c0_35, %c0_36, %c0_37, %c20] : memref<1x1x32x166xf32, #tpu.memory_space<vmem>>, vector<1x1x32x128xf32>
    %33 = vector.shape_cast %32 : vector<1x1x32x128xf32> to vector<32x128xf32>
    %c5 = arith.constant 5 : index
    %c0_38 = arith.constant 0 : index
    %c0_39 = arith.constant 0 : index
    %34 = vector.load %arg3[%c5, %c0_38, %c0_39] : memref<9x32x32xf32, #tpu.memory_space<vmem>>, vector<1x32x32xf32>
    %35 = vector.shape_cast %34 : vector<1x32x32xf32> to vector<32x32xf32>
    %cst_40 = arith.constant dense<0.000000e+00> : vector<32x128xf32>
    %36 = tpu.matmul %35, %33, %cst_40 {dimension_numbers = #tpu.dot_dimension_numbers<[1], [0], [0], [1], [0, 0, 1, 1], [], []>} : vector<32x32xf32>, vector<32x128xf32>, vector<32x128xf32> -> vector<32x128xf32>
    %37 = arith.addf %31, %36 : vector<32x128xf32>
    %c0_41 = arith.constant 0 : index
    %c0_42 = arith.constant 0 : index
    %c0_43 = arith.constant 0 : index
    %c36 = arith.constant 36 : index
    %38 = vector.load %arg2[%c0_41, %c0_42, %c0_43, %c36] : memref<1x1x32x166xf32, #tpu.memory_space<vmem>>, vector<1x1x32x128xf32>
    %39 = vector.shape_cast %38 : vector<1x1x32x128xf32> to vector<32x128xf32>
    %c6 = arith.constant 6 : index
    %c0_44 = arith.constant 0 : index
    %c0_45 = arith.constant 0 : index
    %40 = vector.load %arg3[%c6, %c0_44, %c0_45] : memref<9x32x32xf32, #tpu.memory_space<vmem>>, vector<1x32x32xf32>
    %41 = vector.shape_cast %40 : vector<1x32x32xf32> to vector<32x32xf32>
    %cst_46 = arith.constant dense<0.000000e+00> : vector<32x128xf32>
    %42 = tpu.matmul %41, %39, %cst_46 {dimension_numbers = #tpu.dot_dimension_numbers<[1], [0], [0], [1], [0, 0, 1, 1], [], []>} : vector<32x32xf32>, vector<32x128xf32>, vector<32x128xf32> -> vector<32x128xf32>
    %43 = arith.addf %37, %42 : vector<32x128xf32>
    %c0_47 = arith.constant 0 : index
    %c0_48 = arith.constant 0 : index
    %c0_49 = arith.constant 0 : index
    %c37 = arith.constant 37 : index
    %44 = vector.load %arg2[%c0_47, %c0_48, %c0_49, %c37] : memref<1x1x32x166xf32, #tpu.memory_space<vmem>>, vector<1x1x32x128xf32>
    %45 = vector.shape_cast %44 : vector<1x1x32x128xf32> to vector<32x128xf32>
    %c7 = arith.constant 7 : index
    %c0_50 = arith.constant 0 : index
    %c0_51 = arith.constant 0 : index
    %46 = vector.load %arg3[%c7, %c0_50, %c0_51] : memref<9x32x32xf32, #tpu.memory_space<vmem>>, vector<1x32x32xf32>
    %47 = vector.shape_cast %46 : vector<1x32x32xf32> to vector<32x32xf32>
    %cst_52 = arith.constant dense<0.000000e+00> : vector<32x128xf32>
    %48 = tpu.matmul %47, %45, %cst_52 {dimension_numbers = #tpu.dot_dimension_numbers<[1], [0], [0], [1], [0, 0, 1, 1], [], []>} : vector<32x32xf32>, vector<32x128xf32>, vector<32x128xf32> -> vector<32x128xf32>
    %49 = arith.addf %43, %48 : vector<32x128xf32>
    %c0_53 = arith.constant 0 : index
    %c0_54 = arith.constant 0 : index
    %c0_55 = arith.constant 0 : index
    %c38 = arith.constant 38 : index
    %50 = vector.load %arg2[%c0_53, %c0_54, %c0_55, %c38] : memref<1x1x32x166xf32, #tpu.memory_space<vmem>>, vector<1x1x32x128xf32>
    %51 = vector.shape_cast %50 : vector<1x1x32x128xf32> to vector<32x128xf32>
    %c8 = arith.constant 8 : index
    %c0_56 = arith.constant 0 : index
    %c0_57 = arith.constant 0 : index
    %52 = vector.load %arg3[%c8, %c0_56, %c0_57] : memref<9x32x32xf32, #tpu.memory_space<vmem>>, vector<1x32x32xf32>
    %53 = vector.shape_cast %52 : vector<1x32x32xf32> to vector<32x32xf32>
    %cst_58 = arith.constant dense<0.000000e+00> : vector<32x128xf32>
    %54 = tpu.matmul %53, %51, %cst_58 {dimension_numbers = #tpu.dot_dimension_numbers<[1], [0], [0], [1], [0, 0, 1, 1], [], []>} : vector<32x32xf32>, vector<32x128xf32>, vector<32x128xf32> -> vector<32x128xf32>
    %55 = arith.addf %49, %54 : vector<32x128xf32>
    %56 = vector.broadcast %0 : vector<32x1xf32> to vector<32x128xf32>
    %57 = arith.addf %55, %56 : vector<32x128xf32>
    %cst_59 = arith.constant 0.000000e+00 : f32
    %58 = vector.broadcast %cst_59 : f32 to vector<32x128xf32>
    %59 = arith.cmpf oge, %57, %58 : vector<32x128xf32>
    %cst_60 = arith.constant 0.00999999977 : f32
    %60 = vector.broadcast %cst_60 : f32 to vector<32x128xf32>
    %61 = arith.mulf %60, %57 : vector<32x128xf32>
    %62 = arith.select %59, %57, %61 : vector<32x128xi1>, vector<32x128xf32>
    %c0_61 = arith.constant 0 : index
    %c0_62 = arith.constant 0 : index
    %c0_63 = arith.constant 0 : index
    %63 = vector.load %arg5[%c0_61, %c0_62, %c0_63] : memref<1x32x128xf32, #tpu.memory_space<vmem>>, vector<1x32x128xf32>
    %64 = vector.shape_cast %63 : vector<1x32x128xf32> to vector<32x128xf32>
    %65 = vector.shape_cast %62 : vector<32x128xf32> to vector<1x32x128xf32>
    tpu.vector_store %arg5[%c0_61, %c0_62, %c0_63], %65 {strides = array<i32>} : memref<1x32x128xf32, #tpu.memory_space<vmem>>, vector<1x32x128xf32>,
    return
  }
  func.func @transform_0(%arg0: i32, %arg1: i32) -> (i32, i32, i32, i32) {
    %c0_i32 = arith.constant 0 : i32
    %c0_i32_0 = arith.constant 0 : i32
    %c0_i32_1 = arith.constant 0 : i32
    return %arg0, %arg1, %c0_i32, %c0_i32_0 : i32, i32, i32, i32
  }
  func.func @transform_1(%arg0: i32, %arg1: i32) -> (i32, i32, i32) {
    %c0_i32 = arith.constant 0 : i32
    %c0_i32_0 = arith.constant 0 : i32
    %c0_i32_1 = arith.constant 0 : i32
    %c0_i32_2 = arith.constant 0 : i32
    return %c0_i32, %c0_i32_0, %c0_i32_1 : i32, i32, i32
  }
  func.func @transform_2(%arg0: i32, %arg1: i32) -> (i32, i32) {
    %c0_i32 = arith.constant 0 : i32
    %c0_i32_0 = arith.constant 0 : i32
    %c0_i32_1 = arith.constant 0 : i32
    return %c0_i32, %c0_i32_0 : i32, i32
  }
  func.func @transform_3(%arg0: i32, %arg1: i32) -> (i32, i32, i32) {
    %c0_i32 = arith.constant 0 : i32
    %c0_i32_0 = arith.constant 0 : i32
    return %arg0, %c0_i32, %arg1 : i32, i32, i32
  }
}

module attributes {stable_mosaic.version = 11 : i64} {
  func.func @kernel(%arg0: i32, %arg1: i32, %arg2: memref<1x1x32x166xf32, #tpu.memory_space<vmem>>, %arg3: memref<9x64x32xf32, #tpu.memory_space<vmem>>, %arg4: memref<64x1xf32, #tpu.memory_space<vmem>>, %arg5: memref<1x64x128xf32, #tpu.memory_space<vmem>>) attributes {dimension_semantics = [#tpu.dimension_semantics<parallel>, #tpu.dimension_semantics<parallel>], iteration_bounds = array<i64: 2, 3>, scalar_prefetch = 0 : i64, scratch_operands = 0 : i64, tpu.core_type = #tpu.core_type<tc>, window_params = [{transform_indices = @transform_0, window_bounds = array<i64: 1, 1, 32, 166>}, {pipeline_mode = #tpu.pipeline_mode<synchronous>, transform_indices = @transform_1, window_bounds = array<i64: 9, 64, 32>}, {pipeline_mode = #tpu.pipeline_mode<synchronous>, transform_indices = @transform_2, window_bounds = array<i64: 64, 1>}, {transform_indices = @transform_3, window_bounds = array<i64: 1, 64, 128>}]} {
    %c0 = arith.constant 0 : index
    %c0_0 = arith.constant 0 : index
    %0 = vector.load %arg4[%c0, %c0_0] : memref<64x1xf32, #tpu.memory_space<vmem>>, vector<64x1xf32>
    %cst = arith.constant 0.000000e+00 : f32
    %1 = vector.broadcast %cst : f32 to vector<64x128xf32>
    %c0_1 = arith.constant 0 : index
    %c0_2 = arith.constant 0 : index
    %c0_3 = arith.constant 0 : index
    %c0_4 = arith.constant 0 : index
    %2 = vector.load %arg2[%c0_1, %c0_2, %c0_3, %c0_4] : memref<1x1x32x166xf32, #tpu.memory_space<vmem>>, vector<1x1x32x128xf32>
    %3 = vector.shape_cast %2 : vector<1x1x32x128xf32> to vector<32x128xf32>
    %c0_5 = arith.constant 0 : index
    %c0_6 = arith.constant 0 : index
    %c0_7 = arith.constant 0 : index
    %4 = vector.load %arg3[%c0_5, %c0_6, %c0_7] : memref<9x64x32xf32, #tpu.memory_space<vmem>>, vector<1x64x32xf32>
    %5 = vector.shape_cast %4 : vector<1x64x32xf32> to vector<64x32xf32>
    %cst_8 = arith.constant dense<0.000000e+00> : vector<64x128xf32>
    %6 = tpu.matmul %5, %3, %cst_8 {dimension_numbers = #tpu.dot_dimension_numbers<[1], [0], [0], [1], [0, 0, 1, 1], [], []>} : vector<64x32xf32>, vector<32x128xf32>, vector<64x128xf32> -> vector<64x128xf32>
    %7 = arith.addf %1, %6 : vector<64x128xf32>
    %c0_9 = arith.constant 0 : index
    %c0_10 = arith.constant 0 : index
    %c0_11 = arith.constant 0 : index
    %c1 = arith.constant 1 : index
    %8 = vector.load %arg2[%c0_9, %c0_10, %c0_11, %c1] : memref<1x1x32x166xf32, #tpu.memory_space<vmem>>, vector<1x1x32x128xf32>
    %9 = vector.shape_cast %8 : vector<1x1x32x128xf32> to vector<32x128xf32>
    %c1_12 = arith.constant 1 : index
    %c0_13 = arith.constant 0 : index
    %c0_14 = arith.constant 0 : index
    %10 = vector.load %arg3[%c1_12, %c0_13, %c0_14] : memref<9x64x32xf32, #tpu.memory_space<vmem>>, vector<1x64x32xf32>
    %11 = vector.shape_cast %10 : vector<1x64x32xf32> to vector<64x32xf32>
    %cst_15 = arith.constant dense<0.000000e+00> : vector<64x128xf32>
    %12 = tpu.matmul %11, %9, %cst_15 {dimension_numbers = #tpu.dot_dimension_numbers<[1], [0], [0], [1], [0, 0, 1, 1], [], []>} : vector<64x32xf32>, vector<32x128xf32>, vector<64x128xf32> -> vector<64x128xf32>
    %13 = arith.addf %7, %12 : vector<64x128xf32>
    %c0_16 = arith.constant 0 : index
    %c0_17 = arith.constant 0 : index
    %c0_18 = arith.constant 0 : index
    %c2 = arith.constant 2 : index
    %14 = vector.load %arg2[%c0_16, %c0_17, %c0_18, %c2] : memref<1x1x32x166xf32, #tpu.memory_space<vmem>>, vector<1x1x32x128xf32>
    %15 = vector.shape_cast %14 : vector<1x1x32x128xf32> to vector<32x128xf32>
    %c2_19 = arith.constant 2 : index
    %c0_20 = arith.constant 0 : index
    %c0_21 = arith.constant 0 : index
    %16 = vector.load %arg3[%c2_19, %c0_20, %c0_21] : memref<9x64x32xf32, #tpu.memory_space<vmem>>, vector<1x64x32xf32>
    %17 = vector.shape_cast %16 : vector<1x64x32xf32> to vector<64x32xf32>
    %cst_22 = arith.constant dense<0.000000e+00> : vector<64x128xf32>
    %18 = tpu.matmul %17, %15, %cst_22 {dimension_numbers = #tpu.dot_dimension_numbers<[1], [0], [0], [1], [0, 0, 1, 1], [], []>} : vector<64x32xf32>, vector<32x128xf32>, vector<64x128xf32> -> vector<64x128xf32>
    %19 = arith.addf %13, %18 : vector<64x128xf32>
    %c0_23 = arith.constant 0 : index
    %c0_24 = arith.constant 0 : index
    %c0_25 = arith.constant 0 : index
    %c18 = arith.constant 18 : index
    %20 = vector.load %arg2[%c0_23, %c0_24, %c0_25, %c18] : memref<1x1x32x166xf32, #tpu.memory_space<vmem>>, vector<1x1x32x128xf32>
    %21 = vector.shape_cast %20 : vector<1x1x32x128xf32> to vector<32x128xf32>
    %c3 = arith.constant 3 : index
    %c0_26 = arith.constant 0 : index
    %c0_27 = arith.constant 0 : index
    %22 = vector.load %arg3[%c3, %c0_26, %c0_27] : memref<9x64x32xf32, #tpu.memory_space<vmem>>, vector<1x64x32xf32>
    %23 = vector.shape_cast %22 : vector<1x64x32xf32> to vector<64x32xf32>
    %cst_28 = arith.constant dense<0.000000e+00> : vector<64x128xf32>
    %24 = tpu.matmul %23, %21, %cst_28 {dimension_numbers = #tpu.dot_dimension_numbers<[1], [0], [0], [1], [0, 0, 1, 1], [], []>} : vector<64x32xf32>, vector<32x128xf32>, vector<64x128xf32> -> vector<64x128xf32>
    %25 = arith.addf %19, %24 : vector<64x128xf32>
    %c0_29 = arith.constant 0 : index
    %c0_30 = arith.constant 0 : index
    %c0_31 = arith.constant 0 : index
    %c19 = arith.constant 19 : index
    %26 = vector.load %arg2[%c0_29, %c0_30, %c0_31, %c19] : memref<1x1x32x166xf32, #tpu.memory_space<vmem>>, vector<1x1x32x128xf32>
    %27 = vector.shape_cast %26 : vector<1x1x32x128xf32> to vector<32x128xf32>
    %c4 = arith.constant 4 : index
    %c0_32 = arith.constant 0 : index
    %c0_33 = arith.constant 0 : index
    %28 = vector.load %arg3[%c4, %c0_32, %c0_33] : memref<9x64x32xf32, #tpu.memory_space<vmem>>, vector<1x64x32xf32>
    %29 = vector.shape_cast %28 : vector<1x64x32xf32> to vector<64x32xf32>
    %cst_34 = arith.constant dense<0.000000e+00> : vector<64x128xf32>
    %30 = tpu.matmul %29, %27, %cst_34 {dimension_numbers = #tpu.dot_dimension_numbers<[1], [0], [0], [1], [0, 0, 1, 1], [], []>} : vector<64x32xf32>, vector<32x128xf32>, vector<64x128xf32> -> vector<64x128xf32>
    %31 = arith.addf %25, %30 : vector<64x128xf32>
    %c0_35 = arith.constant 0 : index
    %c0_36 = arith.constant 0 : index
    %c0_37 = arith.constant 0 : index
    %c20 = arith.constant 20 : index
    %32 = vector.load %arg2[%c0_35, %c0_36, %c0_37, %c20] : memref<1x1x32x166xf32, #tpu.memory_space<vmem>>, vector<1x1x32x128xf32>
    %33 = vector.shape_cast %32 : vector<1x1x32x128xf32> to vector<32x128xf32>
    %c5 = arith.constant 5 : index
    %c0_38 = arith.constant 0 : index
    %c0_39 = arith.constant 0 : index
    %34 = vector.load %arg3[%c5, %c0_38, %c0_39] : memref<9x64x32xf32, #tpu.memory_space<vmem>>, vector<1x64x32xf32>
    %35 = vector.shape_cast %34 : vector<1x64x32xf32> to vector<64x32xf32>
    %cst_40 = arith.constant dense<0.000000e+00> : vector<64x128xf32>
    %36 = tpu.matmul %35, %33, %cst_40 {dimension_numbers = #tpu.dot_dimension_numbers<[1], [0], [0], [1], [0, 0, 1, 1], [], []>} : vector<64x32xf32>, vector<32x128xf32>, vector<64x128xf32> -> vector<64x128xf32>
    %37 = arith.addf %31, %36 : vector<64x128xf32>
    %c0_41 = arith.constant 0 : index
    %c0_42 = arith.constant 0 : index
    %c0_43 = arith.constant 0 : index
    %c36 = arith.constant 36 : index
    %38 = vector.load %arg2[%c0_41, %c0_42, %c0_43, %c36] : memref<1x1x32x166xf32, #tpu.memory_space<vmem>>, vector<1x1x32x128xf32>
    %39 = vector.shape_cast %38 : vector<1x1x32x128xf32> to vector<32x128xf32>
    %c6 = arith.constant 6 : index
    %c0_44 = arith.constant 0 : index
    %c0_45 = arith.constant 0 : index
    %40 = vector.load %arg3[%c6, %c0_44, %c0_45] : memref<9x64x32xf32, #tpu.memory_space<vmem>>, vector<1x64x32xf32>
    %41 = vector.shape_cast %40 : vector<1x64x32xf32> to vector<64x32xf32>
    %cst_46 = arith.constant dense<0.000000e+00> : vector<64x128xf32>
    %42 = tpu.matmul %41, %39, %cst_46 {dimension_numbers = #tpu.dot_dimension_numbers<[1], [0], [0], [1], [0, 0, 1, 1], [], []>} : vector<64x32xf32>, vector<32x128xf32>, vector<64x128xf32> -> vector<64x128xf32>
    %43 = arith.addf %37, %42 : vector<64x128xf32>
    %c0_47 = arith.constant 0 : index
    %c0_48 = arith.constant 0 : index
    %c0_49 = arith.constant 0 : index
    %c37 = arith.constant 37 : index
    %44 = vector.load %arg2[%c0_47, %c0_48, %c0_49, %c37] : memref<1x1x32x166xf32, #tpu.memory_space<vmem>>, vector<1x1x32x128xf32>
    %45 = vector.shape_cast %44 : vector<1x1x32x128xf32> to vector<32x128xf32>
    %c7 = arith.constant 7 : index
    %c0_50 = arith.constant 0 : index
    %c0_51 = arith.constant 0 : index
    %46 = vector.load %arg3[%c7, %c0_50, %c0_51] : memref<9x64x32xf32, #tpu.memory_space<vmem>>, vector<1x64x32xf32>
    %47 = vector.shape_cast %46 : vector<1x64x32xf32> to vector<64x32xf32>
    %cst_52 = arith.constant dense<0.000000e+00> : vector<64x128xf32>
    %48 = tpu.matmul %47, %45, %cst_52 {dimension_numbers = #tpu.dot_dimension_numbers<[1], [0], [0], [1], [0, 0, 1, 1], [], []>} : vector<64x32xf32>, vector<32x128xf32>, vector<64x128xf32> -> vector<64x128xf32>
    %49 = arith.addf %43, %48 : vector<64x128xf32>
    %c0_53 = arith.constant 0 : index
    %c0_54 = arith.constant 0 : index
    %c0_55 = arith.constant 0 : index
    %c38 = arith.constant 38 : index
    %50 = vector.load %arg2[%c0_53, %c0_54, %c0_55, %c38] : memref<1x1x32x166xf32, #tpu.memory_space<vmem>>, vector<1x1x32x128xf32>
    %51 = vector.shape_cast %50 : vector<1x1x32x128xf32> to vector<32x128xf32>
    %c8 = arith.constant 8 : index
    %c0_56 = arith.constant 0 : index
    %c0_57 = arith.constant 0 : index
    %52 = vector.load %arg3[%c8, %c0_56, %c0_57] : memref<9x64x32xf32, #tpu.memory_space<vmem>>, vector<1x64x32xf32>
    %53 = vector.shape_cast %52 : vector<1x64x32xf32> to vector<64x32xf32>
    %cst_58 = arith.constant dense<0.000000e+00> : vector<64x128xf32>
    %54 = tpu.matmul %53, %51, %cst_58 {dimension_numbers = #tpu.dot_dimension_numbers<[1], [0], [0], [1], [0, 0, 1, 1], [], []>} : vector<64x32xf32>, vector<32x128xf32>, vector<64x128xf32> -> vector<64x128xf32>
    %55 = arith.addf %49, %54 : vector<64x128xf32>
    %56 = vector.broadcast %0 : vector<64x1xf32> to vector<64x128xf32>
    %57 = arith.addf %55, %56 : vector<64x128xf32>
    %c0_59 = arith.constant 0 : index
    %c0_60 = arith.constant 0 : index
    %c0_61 = arith.constant 0 : index
    %58 = vector.load %arg5[%c0_59, %c0_60, %c0_61] : memref<1x64x128xf32, #tpu.memory_space<vmem>>, vector<1x64x128xf32>
    %59 = vector.shape_cast %58 : vector<1x64x128xf32> to vector<64x128xf32>
    %60 = vector.shape_cast %57 : vector<64x128xf32> to vector<1x64x128xf32>
    tpu.vector_store %arg5[%c0_59, %c0_60, %c0_61], %60 {strides = array<i32>} : memref<1x64x128xf32, #tpu.memory_space<vmem>>, vector<1x64x128xf32>,
    return
  }
  func.func @transform_0(%arg0: i32, %arg1: i32) -> (i32, i32, i32, i32) {
    %c0_i32 = arith.constant 0 : i32
    %c0_i32_0 = arith.constant 0 : i32
    %c0_i32_1 = arith.constant 0 : i32
    return %arg0, %arg1, %c0_i32, %c0_i32_0 : i32, i32, i32, i32
  }
  func.func @transform_1(%arg0: i32, %arg1: i32) -> (i32, i32, i32) {
    %c0_i32 = arith.constant 0 : i32
    %c0_i32_0 = arith.constant 0 : i32
    %c0_i32_1 = arith.constant 0 : i32
    %c0_i32_2 = arith.constant 0 : i32
    return %c0_i32, %c0_i32_0, %c0_i32_1 : i32, i32, i32
  }
  func.func @transform_2(%arg0: i32, %arg1: i32) -> (i32, i32) {
    %c0_i32 = arith.constant 0 : i32
    %c0_i32_0 = arith.constant 0 : i32
    %c0_i32_1 = arith.constant 0 : i32
    return %c0_i32, %c0_i32_0 : i32, i32
  }
  func.func @transform_3(%arg0: i32, %arg1: i32) -> (i32, i32, i32) {
    %c0_i32 = arith.constant 0 : i32
    %c0_i32_0 = arith.constant 0 : i32
    return %arg0, %c0_i32, %arg1 : i32, i32, i32
  }
}

</mosaic_0001>

<bundles_post_ra>
// kernel: basic_stem_forward.3
= control target key start
LH: loop header
LB: loop body
LE: loop exit
PB: predicated region body
PF: predicated region fallthrough
CT: control target
= control target key end

     0   :  { %s1164_s12 = smov 0   ;;  %s1166_s13 = smov 0   ;;  %s1448_s0 = inlined_call_operand.vmem [shape: f32[2,3,3,166], index: 0, kind: input, shape index: {}]   ;;  %s1449_s1 = inlined_call_operand.vmem [shape: f32[9,32,3], index: 1, kind: input, shape index: {}]   ;;  %s1450_s2 = inlined_call_operand.vmem [shape: f32[32,1], index: 2, kind: input, shape index: {}]   ;;  %s1451_s3 = inlined_call_operand.vmem [shape: f32[2,32,384], index: 3, kind: output, shape index: {}]  }
   0x1   :  { %s1168_s14 = smov 0   ;;  %s1170_s15 = smov 0  }
   0x2   :  { %s1172_s16 = smov 0   ;;  %s1174_s17 = smov 0  }
   0x3   :  { %s1176_s18 = smov 0  }
   0x4 LB: > { %s22_s19 = sadd.s32 1, %s1125_s16  ;;  %s25_s20 = sadd.s32 1, %s1129_s17  ;;  %s1133_s18 = sphi %s1176_s18, %s13_s18   ;;  %s1129_s17 = sphi %s1174_s17, %s1458_s17   ;;  %s1125_s16 = sphi %s1172_s16, %s1457_s16   ;;  %s1121_s15 = sphi %s1170_s15, %s1456_s15   ;;  %s1117_s14 = sphi %s1168_s14, %s1455_s14   ;;  %s1113_s13 = sphi %s1166_s13, %s1454_s13   ;;  %s1109_s12 = sphi %s1164_s12, %s1453_s12  }
   0x5   : > { %p23_p0 = scmp.ge.s32.totalorder %s22_s19, 3  ;;  %s917_s21 = sadd.s32 4294967295, %s1133_s18  }
   0x6   : > { %p114_p1 = scmp.ne.s32.totalorder %s1113_s13, %s1109_s12  ;;  %p115_p2 = scmp.eq.s32.totalorder %s917_s21, 5 }
   0x7   : > { %s1460_s19 = smov (%p23_p0, %s22_s19), 0  ;;  %s1462_s20 = smov (!%p23_p0, %s25_s20), %s1129_s17 }
   0x8   : > { %s100_s22 = ssub.s32 %s1125_s16, %s1460_s19  ;;  %p27_p3 = scmp.ge.s32.totalorder %s1462_s20, 2 }
   0x9   : > { %p921_p4 = scmp.ge.s32.totalorder %s1133_s18, 1  ;;  %p1210_p5 = por %p115_p2, %p114_p1 }
   0xa   : > { %p157_p6 = scmp.lt.s32.totalorder %s1133_s18, 7  ;;  %s1464_s20 = smov (%p27_p3, %s1462_s20), 0 }
   0xb   : > { %s99_s24 = ssub.s32 %s1129_s17, %s1464_s20  ;;  %s104_s26 = sadd.s32 1, %s1113_s13 }
   0xc   : > { %p158_p7 = pnand %p921_p4, %p157_p6  ;;  %s101_s25 = sor.u32 %s100_s22, %s99_s24 }
   0xd   : > { %p102_p8 = scmp.eq.s32.totalorder %s101_s25, 0  ;;  %p184_p9 = scmp.lt.s32.totalorder (!%p158_p7), %s1121_s15, 1 }
   0xe   : > { %161 = sbr.rel (%p158_p7) target bundleno = 380 (0x17c), region = 32  ;;  %p186_p10 = scmp.lt.s32.totalorder (!%p158_p7), %s1117_s14, 2 }
   0xf   : > { %s1221_s27 = scalar_select %p102_p8, %s1113_s13, %s104_s26  }
  0x10   : > { %s1135_s10 = smov (!%p158_p7), 127   ;;  %s1136_s11 = smov (!%p158_p7), 126  }
  0x11   : > { %s1137_s21 = smov (!%p158_p7), 110   ;;  %s1138_s22 = smov (!%p158_p7), 109  }
  0x12   : > { %s1139_s24 = smov (!%p158_p7), 92   ;;  %s1140_s25 = smov (!%p158_p7), 91  }
  0x13   : > { %s185_s28 = scalar_select %p184_p9, %s1121_s15, 1  ;;  %vm216_vm0 = vcmask 1039360   ;;  %vm231_vm1 = vcmask 1042432   ;;  %vm384_vm2 = vcmask 900096   ;;  %v927_v29 = vld [vmem:[%s1449_s1 + $0x30] sm:$0xff]  ;;  %vm218_vm3 = vcmask 23552  }
  0x14   : > { %s187_s29 = scalar_select %p186_p10, %s1117_s14, 2  ;;  %v928_v30 = vld [vmem:[%s1449_s1 + $0x38] sm:$0xff]  ;;  %v926_v32 = vld [vmem:[%s1449_s1 + $0x28] sm:$0xff]  ;;  %v925_v34 = vld [vmem:[%s1449_s1 + $0x20] sm:$0xff]  ;;  %vm321_vm4 = vcmask 1031168   ;;  %vm447_vm5 = vcmask 891904  }
  0x15   : > { %s1009_s30 = smul.u32 6, %s185_s28  ;;  %s1141_s26 = smov 108   ;;  %v939_v37 = vld [vmem:[%s1449_s1 + $0x40] sm:$0xff]  ;;  %v940_v43 = vld [vmem:[%s1449_s1 + $0x48] sm:$0xff]  ;;  %v941_v48 = vld [vmem:[%s1449_s1 + $0x50] sm:$0xff]  ;;  %vm573_vm6 = vcmask 752640  }
  0x16   : > { %s923_s4 = sshll.u32 %s187_s29, 1  ;;  %s1142_s28 = smov 90   ;;  %v948_v38 = vld [vmem:[%s1449_s1 + $0x60] sm:$0xff]  ;;  %v949_v44 = vld [vmem:[%s1449_s1 + $0x68] sm:$0xff]  ;;  %v950_v49 = vld [vmem:[%s1449_s1 + $0x70] sm:$0xff]  ;;  %v1143_v60 = vmov 0  }
  0x17   : > { %s190_s5 = sadd.s32 %s1009_s30, %s923_s4  ;;  %v198_v40 = vld [vmem:[%s1449_s1] sm:$0xff]  ;;  %v199_v47 = vld [vmem:[%s1449_s1 + $0x8] sm:$0xff]  ;;  %v200_v51 = vld [vmem:[%s1449_s1 + $0x10] sm:$0xff]  ;;  %1076 = vset.pattern.permute.xlu1 %v1143_v60  ;;  %vm636_vm7 = vcmask 744448   ;;  %1078 = vset.pattern.permute.xlu0 %v1143_v60  ;;  %vm510_vm8 = vcmask 883712   ;;  %vm699_vm9 = vcmask 736256  }
  0x18   : > { %s924_s6 = sshll.u32 %s190_s5, 2  ;;  %v957_v46 = vld [vmem:[%s1449_s1 + $0x80] sm:$0xff]  ;;  %v958_v50 = vld [vmem:[%s1449_s1 + $0x88] sm:$0xff]  ;;  %v942_v54 = vld [vmem:[%s1449_s1 + $0x58] sm:$0xff]  ;;  %1077 = vset.pattern.permute.xlu2 %v1143_v60  ;;  %s181_s29 = sand.u32 1, %s1109_s12  }
  0x19   : > { %s1230_s9 = scalar_lea.vmem %s1448_s0, %s924_s6  ;;  %v951_v55 = vld [vmem:[%s1449_s1 + $0x78] sm:$0xff]  ;;  %v959_v57 = vld [vmem:[%s1449_s1 + $0x90] sm:$0xff]  ;;  %v193_v59 = vld [vmem:[%s1450_s2] sm:$0xff]  ;;  %s922_s30 = sshll.u32 %s181_s29, 5 }
  0x1a   : > { %v202_v0 = vld [vmem:[%s1230_s9] sm:$0x77]  ;;  %v201_v58 = vld [vmem:[%s1449_s1 + $0x18] sm:$0xff]  ;;  %s1410_s4 = scalar_lea.vmem [#allocation2], %s922_s30  ;;  %s1010_s12 = smul.u32 (%p1210_p5), 12, %s1121_s15 }
  0x1b   : > { %209 = vst [vmem:[#allocation1] ss:$2 sm:$0xff] %v202_v0  ;;  %v307_v1 = vld [vmem:[%s1230_s9] sm:$0x77] }
  0x1c   : > { %v370_v4 = vld [vmem:[%s1230_s9] sm:$0x77]  ;;  %s796_s5 = sadd.s32 (%p1210_p5), %s1117_s14, %s1010_s12 }
  0x1d   : > { %v433_v7 = vld [vmem:[%s1230_s9] sm:$0x77]  ;;  %s1003_s6 = sshll.u32 (%p1210_p5), %s796_s5, 3 }
  0x1e   : > { %v496_v10 = vld [vmem:[%s1230_s9] sm:$0x77] }
  0x1f   : > { %v559_v13 = vld [vmem:[%s1230_s9] sm:$0x77] }
  0x20   : > { %v622_v16 = vld [vmem:[%s1230_s9] sm:$0x77] }
  0x21   : > { %v685_v19 = vld [vmem:[%s1230_s9] sm:$0x77] }
  0x22   : > { %v210_v2 = vld.sshfl [vmem:[#allocation1] sm:$0xff pattern:$0x75316420]  ;;  %v211_v3 = vld.sshfl [vmem:[#allocation1 + $0x8] sm:$0xff pattern:$0x75316420] }
  0x23   : > { %212 = vrot.lane.b32.xlu0 %v210_v2, %s1135_s10  ;;  %314 = vst [vmem:[#allocation1] ss:$2 sm:$0xff] %v307_v1  ;;  %v197_v35 = vld [vmem:[%s1230_s9] sm:$0x7] }
  0x24   : > { %v975_v0 = vld [vmem:[%s1449_s1 + $0xc0] sm:$0xff] }
  0x25   : > { %v984_v1 = vld [vmem:[%s1449_s1 + $0xe0] sm:$0xff] }
  0x2a   : > { %v315_v5 = vld.sshfl [vmem:[#allocation1] sm:$0xff pattern:$0x75316420]  ;;  %v316_v6 = vld.sshfl [vmem:[#allocation1 + $0x8] sm:$0xff pattern:$0x75316420] }
  0x2b   : > { %214 = vrot.lane.b32.xlu0 %v211_v3, %s1135_s10  ;;  %317 = vrot.lane.b32.xlu1 %v315_v5, %s1136_s11  ;;  %377 = vst [vmem:[#allocation1] ss:$2 sm:$0xff] %v370_v4  ;;  %v960_v3 = vld [vmem:[%s1449_s1 + $0x98] sm:$0xff]  ;;  %v195_v4 = vld [vmem:[%s1450_s2 + $0x10] sm:$0xff]  ;;  %s798_s10 = scalar_lea.vmem (%p1210_p5), %s1451_s3, %s1003_s6 }
  0x2c   : > { %v196_v5 = vld [vmem:[%s1450_s2 + $0x18] sm:$0xff] }
  0x32   : > { %v378_v8 = vld.sshfl [vmem:[#allocation1] sm:$0xff pattern:$0x75316420]  ;;  %v379_v9 = vld.sshfl [vmem:[#allocation1 + $0x8] sm:$0xff pattern:$0x75316420] }
  0x33   : > { %319 = vrot.lane.b32.xlu1 %v316_v6, %s1136_s11  ;;  %440 = vst [vmem:[#allocation1] ss:$2 sm:$0xff] %v433_v7  ;;  %380 = vrot.lane.b32.xlu2 %v378_v8, %s1137_s21  ;;  %v194_v6 = vld [vmem:[%s1450_s2 + $0x8] sm:$0xff] }
  0x3a   : > { %v442_v11 = vld.sshfl [vmem:[#allocation1 + $0x8] sm:$0xff pattern:$0x75316420]  ;;  %v441_v12 = vld.sshfl [vmem:[#allocation1] sm:$0xff pattern:$0x75316420] }
  0x3b   : > { %445 = vrot.lane.b32.xlu1 %v442_v11, %s1138_s22  ;;  %443 = vrot.lane.b32.xlu0 %v441_v12, %s1138_s22  ;;  %503 = vst [vmem:[#allocation1] ss:$2 sm:$0xff] %v496_v10  ;;  %v976_v11 = vld [vmem:[%s1449_s1 + $0xc8] sm:$0xff] }
  0x3c   : > { %382 = vrot.lane.b32.xlu2 %v379_v9, %s1137_s21  ;;  %v966_v9 = vld [vmem:[%s1449_s1 + $0xa0] sm:$0xff] }
  0x42   : > { %v504_v14 = vld.sshfl [vmem:[#allocation1] sm:$0xff pattern:$0x75316420]  ;;  %v505_v15 = vld.sshfl [vmem:[#allocation1 + $0x8] sm:$0xff pattern:$0x75316420] }
  0x43   : > { %566 = vst [vmem:[#allocation1] ss:$2 sm:$0xff] %v559_v13 }
  0x4a   : > { %v568_v17 = vld.sshfl [vmem:[#allocation1 + $0x8] sm:$0xff pattern:$0x75316420]  ;;  %v567_v18 = vld.sshfl [vmem:[#allocation1] sm:$0xff pattern:$0x75316420] }
  0x4b   : > { %571 = vrot.lane.b32.xlu0 %v568_v17, %s1139_s24  ;;  %629 = vst [vmem:[#allocation1] ss:$2 sm:$0xff] %v622_v16  ;;  %569 = vrot.lane.b32.xlu2 %v567_v18, %s1139_s24  ;;  %v967_v16 = vld [vmem:[%s1449_s1 + $0xa8] sm:$0xff]  ;;  %v977_v17 = vld [vmem:[%s1449_s1 + $0xd0] sm:$0xff] }
  0x4c   : > { %v986_v18 = vld [vmem:[%s1449_s1 + $0xf0] sm:$0xff] }
  0x52   : > { %v630_v20 = vld.sshfl [vmem:[#allocation1] sm:$0xff pattern:$0x75316420]  ;;  %v631_v21 = vld.sshfl [vmem:[#allocation1 + $0x8] sm:$0xff pattern:$0x75316420] }
  0x53   : > { %632 = vrot.lane.b32.xlu1 %v630_v20, %s1140_s25  ;;  %692 = vst [vmem:[#allocation1] ss:$2 sm:$0xff] %v685_v19  ;;  %506 = vrot.lane.b32.xlu0 %v504_v14, %s1141_s26  ;;  %v985_v14 = vld [vmem:[%s1449_s1 + $0xe8] sm:$0xff]  ;;  %v968_v20 = vld [vmem:[%s1449_s1 + $0xb0] sm:$0xff] }
  0x54   : > { %634 = vrot.lane.b32.xlu2 %v631_v21, %s1140_s25  ;;  %v994_v19 = vld [vmem:[%s1449_s1 + $0x108] sm:$0xff]  ;;  %v978_v21 = vld [vmem:[%s1449_s1 + $0xd8] sm:$0xff] }
  0x5a   : > { %v694_v22 = vld.sshfl [vmem:[#allocation1 + $0x8] sm:$0xff pattern:$0x75316420]  ;;  %v693_v23 = vld.sshfl [vmem:[#allocation1] sm:$0xff pattern:$0x75316420] }
  0x5b   : > { %508 = vrot.lane.b32.xlu1 %v505_v15, %s1141_s26  ;;  %697 = vrot.lane.b32.xlu0 %v694_v22, %s1142_s28  ;;  %v993_v15 = vld [vmem:[%s1449_s1 + $0x100] sm:$0xff]  ;;  %v987_v22 = vld [vmem:[%s1449_s1 + $0xf8] sm:$0xff] }
  0x5c   : > { %695 = vrot.lane.b32.xlu2 %v693_v23, %s1142_s28  ;;  %v995_v23 = vld [vmem:[%s1449_s1 + $0x110] sm:$0xff] }
  0x63   : > { %750 = vperm.xlu1 %1076, %v193_v59   ;;  %760 = vperm.xlu0 %1078, %v195_v4  }
  0x64   : > { %755 = vperm.xlu2 %1077, %v194_v6  }
  0x6b   : > { %765 = vperm.xlu1 %1076, %v196_v5  }
  0x8d   : > { %v381_v24 = vpop.permute.xlu2 %380 }
  0x95   : > { %v213_v25 = vpop.permute.xlu0 %212 }
  0x96   : > { %v383_v26 = vpop.permute.xlu2 %382 }
  0x97   : > { %v385_v33 = vsel %vm384_vm2, %v381_v24, %v383_v26  ;;  %v969_v24 = vld [vmem:[%s1449_s1 + $0xb8] sm:$0xff] }
  0x9d   : > { %v215_v27 = vpop.permute.xlu0 %214  ;;  %v318_v28 = vpop.permute.xlu1 %317 }
  0x9e   : > { %v217_v31 = vsel %vm216_vm0, %v213_v25, %v215_v27  ;;  %v996_v25 = vld [vmem:[%s1449_s1 + $0x118] sm:$0xff] }
  0x9f   : > { %1007 = vmatpush.msk.msra.mxu2 %vm231_vm1, %v217_v31  ;;  %1008 = vmatpush.msk.msra.mxu3 %vm231_vm1, %v217_v31 }
  0xa0   : > { %932 = vmatmul.msk.f32.vlgmr.msra.gmra.mxu2 %vm218_vm3, %v927_v29  ;;  %933 = vmatmul.msk.f32.vlgmr.msra.gmra.mxu3 %vm218_vm3, %v928_v30 }
  0xa1   : > { %1006 = vmatpush.msk.msra.mxu1 %vm231_vm1, %v217_v31  ;;  %929 = vmatpush.msk.msra.mxu0 %vm231_vm1, %v217_v31 }
  0xa2   : > { %931 = vmatmul.msk.f32.vlgmr.msra.gmra.mxu1 %vm218_vm3, %v926_v32  ;;  %952 = vmatpush.msk.msrb.mxu3 %vm231_vm1, %v385_v33 }
  0xa3   : > { %930 = vmatmul.msk.f32.vlgmr.msra.gmra.mxu0 %vm218_vm3, %v925_v34  ;;  %934 = vmatpush.msk.msrb.mxu1 %vm231_vm1, %v197_v35 }
  0xa5   : > { %v320_v36 = vpop.permute.xlu1 %319  ;;  %v570_v52 = vpop.permute.xlu2 %569 }
  0xa6   : > { %v322_v39 = vsel %vm321_vm4, %v318_v28, %v320_v36 }
  0xa7   : > { %943 = vmatpush.msk.msrb.mxu2 %vm231_vm1, %v322_v39 }
  0xa8   : > { %944 = vmatmul.msk.f32.vlgmr.msrb.gmra.mxu2 %vm218_vm3, %v939_v37  ;;  %953 = vmatmul.msk.f32.vlgmr.msrb.gmra.mxu3 %vm218_vm3, %v948_v38 }
  0xaa   : > { %935 = vmatmul.msk.f32.vlgmr.msrb.gmra.mxu1 %vm218_vm3, %v198_v40 }
  0xad   : > { %v446_v41 = vpop.permute.xlu1 %445  ;;  %v444_v42 = vpop.permute.xlu0 %443 }
  0xae   : > { %v448_v45 = vsel %vm447_vm5, %v444_v42, %v446_v41  ;;  %v635_v61 = vpop.permute.xlu2 %634 }
  0xaf   : > { %961 = vmatpush.msk.msrb.mxu0 %vm231_vm1, %v448_v45 }
  0xb0   : > { %945 = vmatmul.msk.f32.gmra.mxu2 %vm218_vm3, %v940_v43  ;;  %954 = vmatmul.msk.f32.gmra.mxu3 %vm218_vm3, %v949_v44 }
  0xb1   : > { %962 = vmatmul.msk.f32.vlgmr.msrb.gmra.mxu0 %vm218_vm3, %v957_v46 }
  0xb2   : > { %936 = vmatmul.msk.f32.gmra.mxu1 %vm218_vm3, %v199_v47 }
  0xb6   : > { %v696_v7 = vpop.permute.xlu2 %695 }
  0xb8   : > { %946 = vmatmul.msk.f32.gmra.mxu2 %vm218_vm3, %v941_v48  ;;  %955 = vmatmul.msk.f32.gmra.mxu3 %vm218_vm3, %v950_v49 }
  0xb9   : > { %963 = vmatmul.msk.f32.gmra.mxu0 %vm218_vm3, %v958_v50 }
  0xba   : > { %937 = vmatmul.msk.f32.gmra.mxu1 %vm218_vm3, %v200_v51 }
  0xbd   : > { %v572_v53 = vpop.permute.xlu0 %571 }
  0xbe   : > { %v574_v56 = vsel %vm573_vm6, %v570_v52, %v572_v53 }
  0xbf   : > { %979 = vmatpush.msk.msra.mxu2 %vm231_vm1, %v574_v56 }
  0xc0   : > { %947 = vmatmul.msk.f32.gmra.mxu2 %vm218_vm3, %v942_v54  ;;  %956 = vmatmul.msk.f32.gmra.mxu3 %vm218_vm3, %v951_v55 }
  0xc1   : > { %964 = vmatmul.msk.f32.gmra.mxu0 %vm218_vm3, %v959_v57 }
  0xc2   : > { %938 = vmatmul.msk.f32.gmra.mxu1 %vm218_vm3, %v201_v58 }
  0xc5   : > { %v633_v62 = vpop.permute.xlu1 %632  ;;  %v507_v63 = vpop.permute.xlu0 %506 }
  0xc6   : > { %v637_v2 = vsel %vm636_vm7, %v633_v62, %v635_v61 }
  0xc7   : > { %988 = vmatpush.msk.msra.mxu3 %vm231_vm1, %v637_v2 }
  0xc8   : > { %980 = vmatmul.msk.f32.vlgmr.msra.gmra.mxu2 %vm218_vm3, %v975_v0  ;;  %989 = vmatmul.msk.f32.vlgmr.msra.gmra.mxu3 %vm218_vm3, %v984_v1 }
  0xc9   : > { %965 = vmatmul.msk.f32.gmra.mxu0 %vm218_vm3, %v960_v3 }
  0xcd   : > { %v509_v8 = vpop.permute.xlu1 %508  ;;  %v698_v10 = vpop.permute.xlu0 %697 }
  0xce   : > { %v511_v12 = vsel %vm510_vm8, %v507_v63, %v509_v8  ;;  %v700_v13 = vsel %vm699_vm9, %v696_v7, %v698_v10 }
  0xcf   : > { %970 = vmatpush.msk.msra.mxu1 %vm231_vm1, %v511_v12  ;;  %997 = vmatpush.msk.msra.mxu0 %vm231_vm1, %v700_v13  ;;  %v756_v13 = vpop.permute.xlu2 %755 }
  0xd0   : > { %971 = vmatmul.msk.f32.vlgmr.msra.gmra.mxu1 %vm218_vm3, %v966_v9  ;;  %981 = vmatmul.msk.f32.gmra.mxu2 %vm218_vm3, %v976_v11 }
  0xd1   : > { %990 = vmatmul.msk.f32.gmra.mxu3 %vm218_vm3, %v985_v14  ;;  %998 = vmatmul.msk.f32.vlgmr.msra.gmra.mxu0 %vm218_vm3, %v993_v15 }
  0xd5   : > { %v751_v62 = vpop.permute.xlu1 %750 }
  0xd8   : > { %972 = vmatmul.msk.f32.gmra.mxu1 %vm218_vm3, %v967_v16  ;;  %982 = vmatmul.msk.f32.gmra.mxu2 %vm218_vm3, %v977_v17 }
  0xd9   : > { %991 = vmatmul.msk.f32.gmra.mxu3 %vm218_vm3, %v986_v18  ;;  %999 = vmatmul.msk.f32.gmra.mxu0 %vm218_vm3, %v994_v19 }
  0xe0   : > { %973 = vmatmul.msk.f32.gmra.mxu1 %vm218_vm3, %v968_v20  ;;  %983 = vmatmul.msk.f32.gmra.mxu2 %vm218_vm3, %v978_v21 }
  0xe1   : > { %992 = vmatmul.msk.f32.gmra.mxu3 %vm218_vm3, %v987_v22  ;;  %1000 = vmatmul.msk.f32.gmra.mxu0 %vm218_vm3, %v995_v23 }
  0xe8   : > { %974 = vmatmul.msk.f32.gmra.mxu1 %vm218_vm3, %v969_v24 }
  0xe9   : > { %1001 = vmatmul.msk.f32.gmra.mxu0 %vm218_vm3, %v996_v25 }
 0x11f   : > { %v254_v26 = vpop.f32.mrf.mxu1 }
 0x120   : > { %v251_v29 = vpop.f32.mrf.mxu0 }
 0x123   : > { %v257_v27 = vpop.f32.mrf.mxu2  ;;  %v260_v28 = vpop.f32.mrf.mxu3 }
 0x127   : > { %v295_v30 = vpop.f32.mrf.mxu1 }
 0x128   : > { %v296_v42 = vadd.f32 %v295_v30, %v251_v29 }
 0x12b   : > { %v354_v31 = vpop.f32.mrf.mxu2  ;;  %v417_v32 = vpop.f32.mrf.mxu3 }
 0x12c   : > { %v366_v45 = vadd.f32 %v354_v31, %v296_v42  ;;  %v766_v42 = vpop.permute.xlu1 %765 }
 0x12e   : > { %v480_v33 = vpop.f32.mrf.mxu0  ;;  %v429_v48 = vadd.f32 %v417_v32, %v366_v45 }
 0x12f   : > { %v298_v34 = vpop.f32.mrf.mxu1 }
 0x130   : > { %v299_v49 = vadd.f32 %v298_v34, %v254_v26  ;;  %v492_v52 = vadd.f32 %v480_v33, %v429_v48 }
 0x133   : > { %v357_v35 = vpop.f32.mrf.mxu2  ;;  %v420_v36 = vpop.f32.mrf.mxu3 }
 0x134   : > { %v367_v53 = vadd.f32 %v357_v35, %v299_v49 }
 0x136   : > { %v483_v37 = vpop.f32.mrf.mxu0  ;;  %v430_v57 = vadd.f32 %v420_v36, %v367_v53 }
 0x137   : > { %v301_v38 = vpop.f32.mrf.mxu1 }
 0x138   : > { %v302_v59 = vadd.f32 %v301_v38, %v257_v27  ;;  %v493_v63 = vadd.f32 %v483_v37, %v430_v57 }
 0x13b   : > { %v360_v39 = vpop.f32.mrf.mxu2  ;;  %v423_v40 = vpop.f32.mrf.mxu3 }
 0x13c   : > { %v368_v0 = vadd.f32 %v360_v39, %v302_v59 }
 0x13e   : > { %v486_v41 = vpop.f32.mrf.mxu0  ;;  %v431_v7 = vadd.f32 %v423_v40, %v368_v0 }
 0x13f   : > { %v304_v46 = vpop.f32.mrf.mxu1 }
 0x140   : > { %v305_v10 = vadd.f32 %v304_v46, %v260_v28  ;;  %v494_v15 = vadd.f32 %v486_v41, %v431_v7  ;;  %v761_v28 = vpop.permute.xlu0 %760 }
 0x143   : > { %v363_v43 = vpop.f32.mrf.mxu2  ;;  %v426_v44 = vpop.f32.mrf.mxu3 }
 0x144   : > { %v369_v16 = vadd.f32 %v363_v43, %v305_v10 }
 0x146   : > { %v489_v47 = vpop.f32.mrf.mxu0  ;;  %v432_v23 = vadd.f32 %v426_v44, %v369_v16 }
 0x148   : > { %v495_v29 = vadd.f32 %v489_v47, %v432_v23 }
 0x14b   : > { %v606_v50 = vpop.f32.mrf.mxu2  ;;  %v669_v51 = vpop.f32.mrf.mxu3 }
 0x14d   : > { %v543_v54 = vpop.f32.mrf.mxu1 }
 0x14e   : > { %v555_v55 = vadd.f32 %v543_v54, %v492_v52  ;;  %v732_v56 = vpop.f32.mrf.mxu0 }
 0x150   : > { %v618_v58 = vadd.f32 %v606_v50, %v555_v55 }
 0x152   : > { %v681_v60 = vadd.f32 %v669_v51, %v618_v58 }
 0x153   : > { %v609_v61 = vpop.f32.mrf.mxu2 }
 0x154   : > { %v744_v1 = vadd.f32 %v732_v56, %v681_v60  ;;  %v672_v2 = vpop.f32.mrf.mxu3 }
 0x155   : > { %v546_v3 = vpop.f32.mrf.mxu1 }
 0x156   : > { %v556_v4 = vadd.f32 %v546_v3, %v493_v63  ;;  %v768_v5 = vadd.f32 %v751_v62, %v744_v1  ;;  %v735_v6 = vpop.f32.mrf.mxu0 }
 0x158   : > { %v619_v8 = vadd.f32 %v609_v61, %v556_v4  ;;  %vm772_vm10 = vcmp.ge.f32.partialorder %v768_v5, 0.0  ;;  %v776_v9 = vmul.f32 0.01, %v768_v5 }
 0x15a   : > { %v780_v11 = vsel %vm772_vm10, %v768_v5, %v776_v9  ;;  %v682_v12 = vadd.f32 %v672_v2, %v619_v8 }
 0x15b   : > { %784 = vst [vmem:[%s1410_s4] sm:$0xff] %v780_v11  ;;  %v612_v14 = vpop.f32.mrf.mxu2 }
 0x15c   : > { %v745_v17 = vadd.f32 %v735_v6, %v682_v12  ;;  %v675_v19 = vpop.f32.mrf.mxu3 }
 0x15d   : > { %v549_v18 = vpop.f32.mrf.mxu1 }
 0x15e   : > { %v769_v20 = vadd.f32 %v756_v13, %v745_v17  ;;  %v557_v21 = vadd.f32 %v549_v18, %v494_v15  ;;  %v738_v22 = vpop.f32.mrf.mxu0 }
 0x160   : > { %vm773_vm11 = vcmp.ge.f32.partialorder %v769_v20, 0.0  ;;  %v777_v24 = vmul.f32 0.01, %v769_v20  ;;  %v620_v25 = vadd.f32 %v612_v14, %v557_v21 }
 0x162   : > { %v781_v26 = vsel %vm773_vm11, %v769_v20, %v777_v24  ;;  %v683_v27 = vadd.f32 %v675_v19, %v620_v25  ;;  %v833_v46 = vld [vmem:[%s1410_s4] sm:$0xff] (%p1210_p5) }
 0x163   : > { %785 = vst [vmem:[%s1410_s4 + $0x8] sm:$0xff] %v781_v26  ;;  %v615_v32 = vpop.f32.mrf.mxu2 }
 0x164   : > { %v746_v30 = vadd.f32 %v738_v22, %v683_v27  ;;  %v678_v35 = vpop.f32.mrf.mxu3  ;;  %834 = vst [vmem:[%s798_s10] sm:$0xff] (%p1210_p5), %v833_v46 }
 0x165   : > { %v552_v31 = vpop.f32.mrf.mxu1 }
 0x166   : > { %v770_v33 = vadd.f32 %v761_v28, %v746_v30  ;;  %v558_v34 = vadd.f32 %v552_v31, %v495_v29  ;;  %v741_v38 = vpop.f32.mrf.mxu0 }
 0x168   : > { %vm774_vm12 = vcmp.ge.f32.partialorder %v770_v33, 0.0  ;;  %v778_v36 = vmul.f32 0.01, %v770_v33  ;;  %v621_v37 = vadd.f32 %v615_v32, %v558_v34 }
 0x16a   : > { %v782_v39 = vsel %vm774_vm12, %v770_v33, %v778_v36  ;;  %v684_v40 = vadd.f32 %v678_v35, %v621_v37  ;;  %v835_v47 = vld [vmem:[%s1410_s4 + $0x8] sm:$0xff] (%p1210_p5) }
 0x16b   : > { %786 = vst [vmem:[%s1410_s4 + $0x10] sm:$0xff] %v782_v39 }
 0x16c   : > { %v747_v41 = vadd.f32 %v741_v38, %v684_v40  ;;  %836 = vst [vmem:[%s798_s10 + $0x18] sm:$0xff] (%p1210_p5), %v835_v47 }
 0x16e   : > { %v771_v43 = vadd.f32 %v766_v42, %v747_v41 }
 0x16f   : > { %794 = sbr.rel (!%p1210_p5) target bundleno = 380 (0x17c), region = 36 }
 0x170   : > { %vm775_vm13 = vcmp.ge.f32.partialorder %v771_v43, 0.0  ;;  %v779_v44 = vmul.f32 0.01, %v771_v43 }
 0x172   : > { %v783_v45 = vsel %vm775_vm13, %v771_v43, %v779_v44  ;;  %v837_v48 = vld [vmem:[%s1410_s4 + $0x10] sm:$0xff] (%p1210_p5) }
 0x173   : > { %787 = vst [vmem:[%s1410_s4 + $0x18] sm:$0xff] %v783_v45 }
 0x174   : > { %838 = vst [vmem:[%s798_s10 + $0x30] sm:$0xff] %v837_v48 }
 0x17a   : > { %v839_v49 = vld [vmem:[%s1410_s4 + $0x18] sm:$0xff] }
 0x17b   : > { %840 = vst [vmem:[%s798_s10 + $0x48] sm:$0xff] %v839_v49 }
 0x17c PF: > { %s13_s18 = sadd.s32 1, %s1133_s18   ;;  %s1453_s12 = smov %s1113_s13 }
 0x17d   : > { %p10_p11 = scmp.ge.s32.totalorder %s13_s18, 8   ;;  %s1454_s13 = smov %s1221_s27 }
 0x17e   : > { %s1455_s14 = smov %s1125_s16  ;;  %s1456_s15 = smov %s1129_s17 }
 0x17f   : > { %s1457_s16 = smov %s1460_s19  ;;  %s1458_s17 = smov %s1464_s20 }
 0x180   :  { %12 = sbr.rel (!%p10_p11) target bundleno = 4 (0x4), region = 108 }

// kernel: basic_stem_forward.4
= control target key start
LH: loop header
LB: loop body
LE: loop exit
PB: predicated region body
PF: predicated region fallthrough
CT: control target
= control target key end

     0   :  { %s1431_s12 = smov 0   ;;  %s1433_s13 = smov 0   ;;  %s1752_s0 = inlined_call_operand.vmem [shape: f32[2,3,32,166], index: 0, kind: input, shape index: {}]   ;;  %s1753_s1 = inlined_call_operand.vmem [shape: f32[9,32,32], index: 1, kind: input, shape index: {}]   ;;  %s1754_s2 = inlined_call_operand.vmem [shape: f32[32,1], index: 2, kind: input, shape index: {}]   ;;  %s1755_s3 = inlined_call_operand.vmem [shape: f32[2,32,384], index: 3, kind: output, shape index: {}]  }
   0x1   :  { %s1435_s14 = smov 0   ;;  %s1437_s15 = smov 0  }
   0x2   :  { %s1439_s16 = smov 0   ;;  %s1441_s17 = smov 0  }
   0x3   :  { %s1443_s18 = smov 0  }
   0x4 LB: > { %s22_s19 = sadd.s32 1, %s1392_s16  ;;  %s25_s20 = sadd.s32 1, %s1396_s17  ;;  %s1400_s18 = sphi %s1443_s18, %s13_s18   ;;  %s1396_s17 = sphi %s1441_s17, %s1762_s17   ;;  %s1392_s16 = sphi %s1439_s16, %s1761_s16   ;;  %s1388_s15 = sphi %s1437_s15, %s1760_s15   ;;  %s1384_s14 = sphi %s1435_s14, %s1759_s14   ;;  %s1380_s13 = sphi %s1433_s13, %s1758_s13   ;;  %s1376_s12 = sphi %s1431_s12, %s1757_s12  }
   0x5   : > { %p23_p0 = scmp.ge.s32.totalorder %s22_s19, 3  ;;  %s1024_s21 = sadd.s32 4294967295, %s1400_s18  }
   0x6   : > { %p114_p1 = scmp.ne.s32.totalorder %s1380_s13, %s1376_s12  ;;  %p115_p2 = scmp.eq.s32.totalorder %s1024_s21, 5 }
   0x7   : > { %s1764_s19 = smov (%p23_p0, %s22_s19), 0  ;;  %s1766_s20 = smov (!%p23_p0, %s25_s20), %s1396_s17 }
   0x8   : > { %s100_s22 = ssub.s32 %s1392_s16, %s1764_s19  ;;  %p27_p3 = scmp.ge.s32.totalorder %s1766_s20, 2 }
   0x9   : > { %p1028_p4 = scmp.ge.s32.totalorder %s1400_s18, 1  ;;  %p1477_p5 = por %p115_p2, %p114_p1 }
   0xa   : > { %p157_p6 = scmp.lt.s32.totalorder %s1400_s18, 7  ;;  %s1768_s20 = smov (%p27_p3, %s1766_s20), 0 }
   0xb   : > { %s99_s24 = ssub.s32 %s1396_s17, %s1768_s20  ;;  %s104_s26 = sadd.s32 1, %s1380_s13 }
   0xc   : > { %p158_p7 = pnand %p1028_p4, %p157_p6  ;;  %s101_s25 = sor.u32 %s100_s22, %s99_s24 }
   0xd   : > { %p102_p8 = scmp.eq.s32.totalorder %s101_s25, 0  ;;  %p184_p9 = scmp.lt.s32.totalorder (!%p158_p7), %s1388_s15, 1 }
   0xe   : > { %161 = sbr.rel (%p158_p7) target bundleno = 396 (0x18c), region = 32  ;;  %p186_p10 = scmp.lt.s32.totalorder (!%p158_p7), %s1384_s14, 2 }
   0xf   : > { %s1488_s27 = scalar_select %p102_p8, %s1380_s13, %s104_s26  }
  0x10   : > { %s1402_s10 = smov (!%p158_p7), 127   ;;  %s1403_s11 = smov (!%p158_p7), 126  }
  0x11   : > { %s1404_s21 = smov (!%p158_p7), 110   ;;  %s1405_s22 = smov (!%p158_p7), 109  }
  0x12   : > { %s1406_s24 = smov (!%p158_p7), 92   ;;  %s1407_s25 = smov (!%p158_p7), 91  }
  0x13   : > { %s185_s28 = scalar_select %p184_p9, %s1388_s15, 1  ;;  %vm238_vm0 = vcmask 1039360   ;;  %vm351_vm1 = vcmask 1031168   ;;  %v1035_v39 = vld [vmem:[%s1753_s1 + $0x38] sm:$0xff]  ;;  %vm426_vm2 = vcmask 900096   ;;  %v1034_v41 = vld [vmem:[%s1753_s1 + $0x30] sm:$0xff] }
  0x14   : > { %s187_s29 = scalar_select %p186_p10, %s1384_s14, 2  ;;  %vm247_vm3 = vcmask 261120   ;;  %v1033_v42 = vld [vmem:[%s1753_s1 + $0x28] sm:$0xff]  ;;  %v1032_v50 = vld [vmem:[%s1753_s1 + $0x20] sm:$0xff]  ;;  %vm501_vm4 = vcmask 891904   ;;  %vm651_vm5 = vcmask 752640  }
  0x15   : > { %s1116_s30 = smul.u32 24, %s185_s28  ;;  %s1408_s26 = smov 108   ;;  %v201_v61 = vld [vmem:[%s1753_s1] sm:$0xff]  ;;  %vm726_vm6 = vcmask 744448   ;;  %vm576_vm7 = vcmask 883712   ;;  %vm801_vm8 = vcmask 736256  }
  0x16   : > { %s1030_s4 = sshll.u32 %s187_s29, 3  ;;  %s1409_s28 = smov 90  }
  0x17   : > { %s190_s5 = sadd.s32 %s1116_s30, %s1030_s4  ;;  %s181_s29 = sand.u32 1, %s1376_s12  }
  0x18   : > { %s1031_s6 = sshll.u32 %s190_s5, 3  ;;  %s1029_s30 = sshll.u32 %s181_s29, 5 }
  0x19   : > { %s192_s9 = scalar_lea.vmem %s1752_s0, %s1031_s6  ;;  %s1714_s4 = scalar_lea.vmem [#allocation2], %s1029_s30 }
  0x1a   : > { %v1497_v0 = vld [vmem:[%s192_s9 + $0x30] sm:$0xff]  ;;  %v208_v1 = vld [vmem:[%s192_s9 + $0x38] sm:$0xff]  ;;  %v1503_v6 = vld [vmem:[%s192_s9 + $0x20] sm:$0xff]  ;;  %s1117_s12 = smul.u32 (%p1477_p5), 12, %s1388_s15 }
  0x1b   : > { %v1499_v2 = vld [vmem:[%s192_s9 + $0x10] sm:$0xff]  ;;  %v1183_v3 = vpack.i.bf16 %v208_v1, %v1497_v0  ;;  %v206_v4 = vld [vmem:[%s192_s9 + $0x18] sm:$0xff]  ;;  %v207_v7 = vld [vmem:[%s192_s9 + $0x28] sm:$0xff] }
  0x1c   : > { %v1193_v5 = vpack.i.bf16 %v206_v4, %v1499_v2  ;;  %v1505_v8 = vld [vmem:[%s192_s9] sm:$0xff]  ;;  %v205_v9 = vld [vmem:[%s192_s9 + $0x8] sm:$0xff]  ;;  %v1188_v10 = vpack.i.bf16 %v207_v7, %v1503_v6  ;;  %s903_s5 = sadd.s32 (%p1477_p5), %s1384_s14, %s1117_s12 }
  0x1d   : > { %1184 = vrot.lane.b32.xlu0 %v1183_v3, %s1402_s10  ;;  %1204 = vrot.lane.b32.xlu2 %v1183_v3, %s1403_s11  ;;  %v1198_v11 = vpack.i.bf16 %v205_v9, %v1505_v8  ;;  %s1101_s6 = sshll.u32 (%p1477_p5), %s903_s5, 3 }
  0x1e   : > { %1194 = vrot.lane.b32.xlu1 %v1193_v5, %s1402_s10  ;;  %s905_s9 = scalar_lea.vmem (%p1477_p5), %s1755_s3, %s1101_s6 }
  0x25   : > { %1189 = vrot.lane.b32.xlu0 %v1188_v10, %s1402_s10  ;;  %1209 = vrot.lane.b32.xlu2 %v1188_v10, %s1403_s11 }
  0x26   : > { %1199 = vrot.lane.b32.xlu1 %v1198_v11, %s1402_s10 }
  0x2d   : > { %1214 = vrot.lane.b32.xlu0 %v1183_v3, %s1404_s21  ;;  %1224 = vrot.lane.b32.xlu2 %v1188_v10, %s1404_s21 }
  0x2e   : > { %1219 = vrot.lane.b32.xlu1 %v1193_v5, %s1403_s11 }
  0x35   : > { %1229 = vrot.lane.b32.xlu0 %v1198_v11, %s1403_s11  ;;  %1239 = vrot.lane.b32.xlu2 %v1198_v11, %s1404_s21 }
  0x36   : > { %1234 = vrot.lane.b32.xlu1 %v1193_v5, %s1404_s21 }
  0x3d   : > { %1244 = vrot.lane.b32.xlu0 %v1183_v3, %s1405_s22  ;;  %1254 = vrot.lane.b32.xlu2 %v1193_v5, %s1405_s22 }
  0x3e   : > { %1249 = vrot.lane.b32.xlu1 %v1188_v10, %s1405_s22 }
  0x45   : > { %1259 = vrot.lane.b32.xlu0 %v1198_v11, %s1405_s22  ;;  %1269 = vrot.lane.b32.xlu2 %v1188_v10, %s1406_s24 }
  0x46   : > { %1264 = vrot.lane.b32.xlu1 %v1183_v3, %s1406_s24 }
  0x4d   : > { %1274 = vrot.lane.b32.xlu0 %v1183_v3, %s1407_s25  ;;  %1284 = vrot.lane.b32.xlu2 %v1193_v5, %s1406_s24 }
  0x4e   : > { %1279 = vrot.lane.b32.xlu1 %v1183_v3, %s1408_s26 }
  0x55   : > { %1289 = vrot.lane.b32.xlu0 %v1188_v10, %s1407_s25  ;;  %1299 = vrot.lane.b32.xlu2 %v1198_v11, %s1406_s24 }
  0x56   : > { %1294 = vrot.lane.b32.xlu1 %v1188_v10, %s1408_s26 }
  0x5d   : > { %1304 = vrot.lane.b32.xlu0 %v1193_v5, %s1407_s25  ;;  %1314 = vrot.lane.b32.xlu2 %v1198_v11, %s1407_s25 }
  0x5e   : > { %1309 = vrot.lane.b32.xlu1 %v1193_v5, %s1408_s26 }
  0x65   : > { %1319 = vrot.lane.b32.xlu0 %v1198_v11, %s1408_s26  ;;  %1329 = vrot.lane.b32.xlu2 %v1188_v10, %s1409_s28 }
  0x66   : > { %1324 = vrot.lane.b32.xlu1 %v1183_v3, %s1409_s28 }
  0x6d   : > { %1334 = vrot.lane.b32.xlu0 %v1193_v5, %s1409_s28 }
  0x6e   : > { %1339 = vrot.lane.b32.xlu1 %v1198_v11, %s1409_s28 }
  0x77   : > { %v1205_v12 = vpop.permute.xlu2 %1204 }
  0x78   : > { %v1207_v31 = vunpack.i.h.bf16 %v1205_v12  ;;  %v1206_v32 = vunpack.i.l.bf16 %v1205_v12  ;;  %v202_v12 = vld [vmem:[%s1753_s1 + $0x8] sm:$0xff] }
  0x7a   : > { %v355_v46 = vsel %vm351_vm1, %v1206_v32, %v1207_v31 }
  0x7f   : > { %v1210_v13 = vpop.permute.xlu2 %1209 }
  0x80   : > { %v1212_v33 = vunpack.i.h.bf16 %v1210_v13  ;;  %v1211_v34 = vunpack.i.l.bf16 %v1210_v13 }
  0x82   : > { %v354_v47 = vsel %vm351_vm1, %v1211_v34, %v1212_v33  ;;  %v1046_v34 = vld [vmem:[%s1753_s1 + $0x50] sm:$0xff] }
  0x87   : > { %v1225_v14 = vpop.permute.xlu2 %1224 }
  0x88   : > { %v1227_v37 = vunpack.i.h.bf16 %v1225_v14  ;;  %v1226_v38 = vunpack.i.l.bf16 %v1225_v14 }
  0x8a   : > { %v429_v52 = vsel %vm426_vm2, %v1226_v38, %v1227_v37 }
  0x8f   : > { %v1185_v15 = vpop.permute.xlu0 %1184  ;;  %v1510_v20 = vpop.permute.xlu2 %1239 }
  0x90   : > { %v1187_v16 = vunpack.i.h.bf16 %v1185_v15  ;;  %v1186_v17 = vunpack.i.l.bf16 %v1185_v15  ;;  %v1195_v18 = vpop.permute.xlu1 %1194  ;;  %v1242_v56 = vunpack.i.h.bf16 %v1510_v20  ;;  %v1241_v57 = vunpack.i.l.bf16 %v1510_v20  ;;  %v1045_v15 = vld [vmem:[%s1753_s1 + $0x48] sm:$0xff] }
  0x91   : > { %v1197_v22 = vunpack.i.h.bf16 %v1195_v18  ;;  %v1196_v23 = vunpack.i.l.bf16 %v1195_v18 }
  0x92   : > { %v242_v19 = vsel %vm238_vm0, %v1186_v17, %v1187_v16  ;;  %v427_v4 = vsel %vm426_vm2, %v1241_v57, %v1242_v56 }
  0x93   : > { %272 = vmatpush.msra.mxu0 %v242_v19  ;;  %1104 = vmatpush.msra.mxu1 %v242_v19  ;;  %v240_v35 = vsel %vm238_vm0, %v1196_v23, %v1197_v22 }
  0x94   : > { %1105 = vmatpush.msra.mxu2 %v242_v19  ;;  %1106 = vmatpush.msra.mxu3 %v242_v19  ;;  %v1053_v19 = vld [vmem:[%s1753_s1 + $0x68] sm:$0xff] }
  0x97   : > { %v1190_v21 = vpop.permute.xlu0 %1189  ;;  %v1513_v30 = vpop.permute.xlu2 %1254 }
  0x98   : > { %v1192_v24 = vunpack.i.h.bf16 %v1190_v21  ;;  %v1191_v25 = vunpack.i.l.bf16 %v1190_v21  ;;  %v1200_v26 = vpop.permute.xlu1 %1199  ;;  %v1257_v10 = vunpack.i.h.bf16 %v1513_v30  ;;  %v1256_v11 = vunpack.i.l.bf16 %v1513_v30  ;;  %v1060_v30 = vld [vmem:[%s1753_s1 + $0x80] sm:$0xff] }
  0x99   : > { %v1202_v27 = vunpack.i.h.bf16 %v1200_v26  ;;  %v1201_v28 = vunpack.i.l.bf16 %v1200_v26  ;;  %v203_v26 = vld [vmem:[%s1753_s1 + $0x10] sm:$0xff] }
  0x9a   : > { %v241_v29 = vsel %vm238_vm0, %v1191_v25, %v1192_v24  ;;  %v503_v18 = vsel %vm501_vm4, %v1256_v11, %v1257_v10 }
  0x9b   : > { %273 = vmatpush.msra.mxu0 %v241_v29  ;;  %1107 = vmatpush.msra.mxu1 %v241_v29  ;;  %v239_v36 = vsel %vm238_vm0, %v1201_v28, %v1202_v27 }
  0x9c   : > { %1108 = vmatpush.msra.mxu2 %v241_v29  ;;  %1109 = vmatpush.msra.mxu3 %v241_v29 }
  0x9d   : > { %274 = vmatpush.msra.mxu0 %v240_v35  ;;  %1110 = vmatpush.msra.mxu1 %v240_v35 }
  0x9e   : > { %1111 = vmatpush.msra.mxu2 %v240_v35  ;;  %1112 = vmatpush.msra.mxu3 %v240_v35 }
  0x9f   : > { %v1215_v40 = vpop.permute.xlu0 %1214  ;;  %275 = vmatpush.msra.mxu0 %v239_v36  ;;  %1113 = vmatpush.msra.mxu1 %v239_v36  ;;  %v1539_v54 = vpop.permute.xlu2 %1269 }
  0xa0   : > { %v1217_v43 = vunpack.i.h.bf16 %v1215_v40  ;;  %v1216_v44 = vunpack.i.l.bf16 %v1215_v40  ;;  %v1220_v45 = vpop.permute.xlu1 %1219  ;;  %1114 = vmatpush.msra.mxu2 %v239_v36  ;;  %1115 = vmatpush.msra.mxu3 %v239_v36  ;;  %v1272_v21 = vunpack.i.h.bf16 %v1539_v54  ;;  %v1271_v22 = vunpack.i.l.bf16 %v1539_v54 }
  0xa1   : > { %v1222_v48 = vunpack.i.h.bf16 %v1220_v45  ;;  %v1221_v49 = vunpack.i.l.bf16 %v1220_v45  ;;  %1039 = vmatmul.msk.f32.vlgmr.msra.gmra.mxu3 %vm247_vm3, %v1035_v39  ;;  %1038 = vmatmul.msk.f32.vlgmr.msra.gmra.mxu2 %vm247_vm3, %v1034_v41  ;;  %v1054_v39 = vld [vmem:[%s1753_s1 + $0x70] sm:$0xff] }
  0xa2   : > { %384 = vmatpush.msrb.mxu2 %v355_v46  ;;  %v430_v51 = vsel %vm426_vm2, %v1216_v44, %v1217_v43  ;;  %1037 = vmatmul.msk.f32.vlgmr.msra.gmra.mxu1 %vm247_vm3, %v1033_v42  ;;  %v654_v36 = vsel %vm651_vm5, %v1271_v22, %v1272_v21  ;;  %v204_v46 = vld [vmem:[%s1753_s1 + $0x18] sm:$0xff] }
  0xa3   : > { %v353_v53 = vsel %vm351_vm1, %v1221_v49, %v1222_v48  ;;  %459 = vmatpush.msrb.mxu3 %v430_v51  ;;  %313 = vmatpush.msrb.mxu1 %v1497_v0  ;;  %v1044_v0 = vld [vmem:[%s1753_s1 + $0x40] sm:$0xff]  ;;  %v1061_v49 = vld [vmem:[%s1753_s1 + $0x88] sm:$0xff]  ;;  %v1047_v51 = vld [vmem:[%s1753_s1 + $0x58] sm:$0xff] }
  0xa4   : > { %385 = vmatpush.msrb.mxu2 %v354_v47  ;;  %1036 = vmatmul.msk.f32.vlgmr.msra.gmra.mxu0 %vm247_vm3, %v1032_v50 }
  0xa5   : > { %460 = vmatpush.msrb.mxu3 %v429_v52  ;;  %314 = vmatpush.msrb.mxu1 %v1503_v6 }
  0xa6   : > { %386 = vmatpush.msrb.mxu2 %v353_v53  ;;  %v1055_v53 = vld [vmem:[%s1753_s1 + $0x78] sm:$0xff] }
  0xa7   : > { %v1230_v55 = vpop.permute.xlu0 %1229  ;;  %315 = vmatpush.msrb.mxu1 %v1499_v2  ;;  %v1052_v2 = vld [vmem:[%s1753_s1 + $0x60] sm:$0xff]  ;;  %v1285_v5 = vpop.permute.xlu2 %1284 }
  0xa8   : > { %v1232_v58 = vunpack.i.h.bf16 %v1230_v55  ;;  %v1231_v59 = vunpack.i.l.bf16 %v1230_v55  ;;  %v1235_v60 = vpop.permute.xlu1 %1234  ;;  %v1287_v31 = vunpack.i.h.bf16 %v1285_v5  ;;  %v1286_v32 = vunpack.i.l.bf16 %v1285_v5 }
  0xa9   : > { %v1237_v62 = vunpack.i.h.bf16 %v1235_v60  ;;  %v1236_v63 = vunpack.i.l.bf16 %v1235_v60  ;;  %316 = vmatpush.msrb.mxu1 %v1505_v8  ;;  %v1062_v60 = vld [vmem:[%s1753_s1 + $0x90] sm:$0xff] }
  0xaa   : > { %v352_v1 = vsel %vm351_vm1, %v1231_v59, %v1232_v58  ;;  %1040 = vmatmul.msk.f32.vlgmr.msrb.gmra.mxu1 %vm247_vm3, %v201_v61  ;;  %v653_v40 = vsel %vm651_vm5, %v1286_v32, %v1287_v31  ;;  %v1085_v31 = vld [vmem:[%s1753_s1 + $0xe8] sm:$0xff]  ;;  %v195_v32 = vld [vmem:[%s1754_s2 + $0x10] sm:$0xff] }
  0xab   : > { %v428_v3 = vsel %vm426_vm2, %v1236_v63, %v1237_v62  ;;  %387 = vmatpush.msrb.mxu2 %v352_v1  ;;  %v1076_v63 = vld [vmem:[%s1753_s1 + $0xc0] sm:$0xff] }
  0xac   : > { %461 = vmatpush.msrb.mxu3 %v428_v3  ;;  %1048 = vmatmul.msk.f32.vlgmr.msrb.gmra.mxu2 %vm247_vm3, %v1044_v0 }
  0xae   : > { %462 = vmatpush.msrb.mxu3 %v427_v4 }
  0xaf   : > { %v1245_v6 = vpop.permute.xlu0 %1244  ;;  %1056 = vmatmul.msk.f32.vlgmr.msrb.gmra.mxu3 %vm247_vm3, %v1052_v2  ;;  %v1300_v27 = vpop.permute.xlu2 %1299 }
  0xb0   : > { %v1247_v7 = vunpack.i.h.bf16 %v1245_v6  ;;  %v1246_v8 = vunpack.i.l.bf16 %v1245_v6  ;;  %v1250_v9 = vpop.permute.xlu1 %1249  ;;  %v1302_v37 = vunpack.i.h.bf16 %v1300_v27  ;;  %v1301_v38 = vunpack.i.l.bf16 %v1300_v27 }
  0xb1   : > { %v1252_v13 = vunpack.i.h.bf16 %v1250_v9  ;;  %v1251_v14 = vunpack.i.l.bf16 %v1250_v9  ;;  %v1063_v9 = vld [vmem:[%s1753_s1 + $0x98] sm:$0xff] }
  0xb2   : > { %v505_v16 = vsel %vm501_vm4, %v1246_v8, %v1247_v7  ;;  %1041 = vmatmul.msk.f32.gmra.mxu1 %vm247_vm3, %v202_v12  ;;  %v652_v42 = vsel %vm651_vm5, %v1301_v38, %v1302_v37  ;;  %v1077_v12 = vld [vmem:[%s1753_s1 + $0xc8] sm:$0xff] }
  0xb3   : > { %534 = vmatpush.msrb.mxu0 %v505_v16  ;;  %v504_v17 = vsel %vm501_vm4, %v1251_v14, %v1252_v13  ;;  %v1084_v14 = vld [vmem:[%s1753_s1 + $0xe0] sm:$0xff]  ;;  %v194_v16 = vld [vmem:[%s1754_s2 + $0x8] sm:$0xff] }
  0xb4   : > { %1049 = vmatmul.msk.f32.gmra.mxu2 %vm247_vm3, %v1045_v15 }
  0xb5   : > { %535 = vmatpush.msrb.mxu0 %v504_v17 }
  0xb7   : > { %v1260_v20 = vpop.permute.xlu0 %1259  ;;  %536 = vmatpush.msrb.mxu0 %v503_v18  ;;  %1057 = vmatmul.msk.f32.gmra.mxu3 %vm247_vm3, %v1053_v19  ;;  %v1315_v62 = vpop.permute.xlu2 %1314 }
  0xb8   : > { %v1262_v23 = vunpack.i.h.bf16 %v1260_v20  ;;  %v1261_v24 = vunpack.i.l.bf16 %v1260_v20  ;;  %v1265_v25 = vpop.permute.xlu1 %1264  ;;  %v1317_v1 = vunpack.i.h.bf16 %v1315_v62  ;;  %v1316_v3 = vunpack.i.l.bf16 %v1315_v62 }
  0xb9   : > { %v1267_v28 = vunpack.i.h.bf16 %v1265_v25  ;;  %v1266_v29 = vunpack.i.l.bf16 %v1265_v25  ;;  %v1410_v20 = vmov 0  }
  0xba   : > { %v502_v33 = vsel %vm501_vm4, %v1261_v24, %v1262_v23  ;;  %1042 = vmatmul.msk.f32.gmra.mxu1 %vm247_vm3, %v203_v26  ;;  %v727_v11 = vsel %vm726_vm6, %v1316_v3, %v1317_v1  ;;  %1344 = vset.pattern.permute.xlu0 %v1410_v20  ;;  %v1068_v26 = vld [vmem:[%s1753_s1 + $0xa0] sm:$0xff] }
  0xbb   : > { %v655_v35 = vsel %vm651_vm5, %v1266_v29, %v1267_v28  ;;  %537 = vmatpush.msrb.mxu0 %v502_v33  ;;  %1345 = vset.pattern.permute.xlu1 %v1410_v20  ;;  %v1078_v28 = vld [vmem:[%s1753_s1 + $0xd0] sm:$0xff]  ;;  %v193_v33 = vld [vmem:[%s1754_s2] sm:$0xff] }
  0xbc   : > { %684 = vmatpush.msra.mxu2 %v655_v35  ;;  %1064 = vmatmul.msk.f32.vlgmr.msrb.gmra.mxu0 %vm247_vm3, %v1060_v30 }
  0xbd   : > { %1050 = vmatmul.msk.f32.gmra.mxu2 %vm247_vm3, %v1046_v34  ;;  %862 = vperm.xlu0 %1344, %v194_v16  }
  0xbe   : > { %685 = vmatpush.msra.mxu2 %v654_v36  ;;  %1343 = vset.pattern.permute.xlu2 %v1410_v20 }
  0xbf   : > { %v1275_v41 = vpop.permute.xlu0 %1274  ;;  %1058 = vmatmul.msk.f32.gmra.mxu3 %vm247_vm3, %v1054_v39  ;;  %v1330_v15 = vpop.permute.xlu2 %1329  ;;  %867 = vperm.xlu1 %1345, %v195_v32  }
  0xc0   : > { %v1277_v43 = vunpack.i.h.bf16 %v1275_v41  ;;  %v1276_v44 = vunpack.i.l.bf16 %v1275_v41  ;;  %v1280_v45 = vpop.permute.xlu1 %1279  ;;  %686 = vmatpush.msra.mxu2 %v653_v40  ;;  %v1332_v18 = vunpack.i.h.bf16 %v1330_v15  ;;  %v1331_v19 = vunpack.i.l.bf16 %v1330_v15  ;;  %857 = vperm.xlu2 %1343, %v193_v33   ;;  %v1069_v40 = vld [vmem:[%s1753_s1 + $0xa8] sm:$0xff] }
  0xc1   : > { %v1282_v47 = vunpack.i.h.bf16 %v1280_v45  ;;  %v1281_v48 = vunpack.i.l.bf16 %v1280_v45  ;;  %v1086_v45 = vld [vmem:[%s1753_s1 + $0xf0] sm:$0xff] }
  0xc2   : > { %v730_v50 = vsel %vm726_vm6, %v1276_v44, %v1277_v43  ;;  %687 = vmatpush.msra.mxu2 %v652_v42  ;;  %1043 = vmatmul.msk.f32.gmra.mxu1 %vm247_vm3, %v204_v46  ;;  %v804_v30 = vsel %vm801_vm8, %v1331_v19, %v1332_v18  ;;  %v1079_v42 = vld [vmem:[%s1753_s1 + $0xd8] sm:$0xff]  ;;  %v1092_v44 = vld [vmem:[%s1753_s1 + $0x100] sm:$0xff] }
  0xc3   : > { %v580_v52 = vsel %vm576_vm7, %v1281_v48, %v1282_v47  ;;  %759 = vmatpush.msra.mxu3 %v730_v50  ;;  %v196_v46 = vld [vmem:[%s1754_s2 + $0x18] sm:$0xff]  ;;  %v1070_v47 = vld [vmem:[%s1753_s1 + $0xb0] sm:$0xff]  ;;  %v1093_v48 = vld [vmem:[%s1753_s1 + $0x108] sm:$0xff] }
  0xc4   : > { %609 = vmatpush.msra.mxu1 %v580_v52  ;;  %1065 = vmatmul.msk.f32.gmra.mxu0 %vm247_vm3, %v1061_v49  ;;  %v1087_v49 = vld [vmem:[%s1753_s1 + $0xf8] sm:$0xff] }
  0xc5   : > { %1051 = vmatmul.msk.f32.gmra.mxu2 %vm247_vm3, %v1047_v51  ;;  %v1071_v50 = vld [vmem:[%s1753_s1 + $0xb8] sm:$0xff]  ;;  %v1094_v51 = vld [vmem:[%s1753_s1 + $0x110] sm:$0xff] }
  0xc6   : > { %v1095_v52 = vld [vmem:[%s1753_s1 + $0x118] sm:$0xff] }
  0xc7   : > { %v1290_v54 = vpop.permute.xlu0 %1289  ;;  %1059 = vmatmul.msk.f32.gmra.mxu3 %vm247_vm3, %v1055_v53 }
  0xc8   : > { %v1292_v55 = vunpack.i.h.bf16 %v1290_v54  ;;  %v1291_v56 = vunpack.i.l.bf16 %v1290_v54  ;;  %v1295_v57 = vpop.permute.xlu1 %1294  ;;  %872 = vperm.xlu2 %1343, %v196_v46  }
  0xc9   : > { %v1297_v58 = vunpack.i.h.bf16 %v1295_v57  ;;  %v1296_v59 = vunpack.i.l.bf16 %v1295_v57 }
  0xca   : > { %v729_v61 = vsel %vm726_vm6, %v1291_v56, %v1292_v55 }
  0xcb   : > { %v579_v0 = vsel %vm576_vm7, %v1296_v59, %v1297_v58  ;;  %760 = vmatpush.msra.mxu3 %v729_v61 }
  0xcc   : > { %610 = vmatpush.msra.mxu1 %v579_v0  ;;  %1066 = vmatmul.msk.f32.gmra.mxu0 %vm247_vm3, %v1062_v60 }
  0xcd   : > { %1080 = vmatmul.msk.f32.vlgmr.msra.gmra.mxu2 %vm247_vm3, %v1076_v63 }
  0xcf   : > { %v1305_v4 = vpop.permute.xlu0 %1304 }
  0xd0   : > { %v1307_v2 = vunpack.i.h.bf16 %v1305_v4  ;;  %v1306_v5 = vunpack.i.l.bf16 %v1305_v4  ;;  %v1310_v6 = vpop.permute.xlu1 %1309 }
  0xd1   : > { %v1312_v7 = vunpack.i.h.bf16 %v1310_v6  ;;  %v1311_v8 = vunpack.i.l.bf16 %v1310_v6 }
  0xd2   : > { %v728_v10 = vsel %vm726_vm6, %v1306_v5, %v1307_v2 }
  0xd3   : > { %v578_v13 = vsel %vm576_vm7, %v1311_v8, %v1312_v7  ;;  %761 = vmatpush.msra.mxu3 %v728_v10 }
  0xd4   : > { %611 = vmatpush.msra.mxu1 %v578_v13  ;;  %1067 = vmatmul.msk.f32.gmra.mxu0 %vm247_vm3, %v1063_v9 }
  0xd5   : > { %762 = vmatpush.msra.mxu3 %v727_v11  ;;  %1081 = vmatmul.msk.f32.gmra.mxu2 %vm247_vm3, %v1077_v12 }
  0xd6   : > { %1088 = vmatmul.msk.f32.vlgmr.msra.gmra.mxu3 %vm247_vm3, %v1084_v14 }
  0xd7   : > { %v1320_v17 = vpop.permute.xlu0 %1319 }
  0xd8   : > { %v1322_v21 = vunpack.i.h.bf16 %v1320_v17  ;;  %v1321_v22 = vunpack.i.l.bf16 %v1320_v17  ;;  %v1325_v23 = vpop.permute.xlu1 %1324 }
  0xd9   : > { %v1327_v24 = vunpack.i.h.bf16 %v1325_v23  ;;  %v1326_v25 = vunpack.i.l.bf16 %v1325_v23 }
  0xda   : > { %v577_v27 = vsel %vm576_vm7, %v1321_v22, %v1322_v21 }
  0xdb   : > { %612 = vmatpush.msra.mxu1 %v577_v27  ;;  %v805_v29 = vsel %vm801_vm8, %v1326_v25, %v1327_v24 }
  0xdc   : > { %834 = vmatpush.msra.mxu0 %v805_v29  ;;  %1072 = vmatmul.msk.f32.vlgmr.msra.gmra.mxu1 %vm247_vm3, %v1068_v26 }
  0xdd   : > { %1082 = vmatmul.msk.f32.gmra.mxu2 %vm247_vm3, %v1078_v28 }
  0xde   : > { %835 = vmatpush.msra.mxu0 %v804_v30  ;;  %1089 = vmatmul.msk.f32.gmra.mxu3 %vm247_vm3, %v1085_v31 }
  0xdf   : > { %v1335_v34 = vpop.permute.xlu0 %1334 }
  0xe0   : > { %v1337_v35 = vunpack.i.h.bf16 %v1335_v34  ;;  %v1336_v36 = vunpack.i.l.bf16 %v1335_v34  ;;  %v1340_v37 = vpop.permute.xlu1 %1339 }
  0xe1   : > { %v1342_v38 = vunpack.i.h.bf16 %v1340_v37  ;;  %v1341_v39 = vunpack.i.l.bf16 %v1340_v37 }
  0xe2   : > { %v803_v41 = vsel %vm801_vm8, %v1336_v36, %v1337_v35 }
  0xe3   : > { %836 = vmatpush.msra.mxu0 %v803_v41  ;;  %v802_v43 = vsel %vm801_vm8, %v1341_v39, %v1342_v38 }
  0xe4   : > { %1073 = vmatmul.msk.f32.gmra.mxu1 %vm247_vm3, %v1069_v40 }
  0xe5   : > { %837 = vmatpush.msra.mxu0 %v802_v43  ;;  %1083 = vmatmul.msk.f32.gmra.mxu2 %vm247_vm3, %v1079_v42 }
  0xe6   : > { %1096 = vmatmul.msk.f32.vlgmr.msra.gmra.mxu0 %vm247_vm3, %v1092_v44  ;;  %1090 = vmatmul.msk.f32.gmra.mxu3 %vm247_vm3, %v1086_v45 }
  0xec   : > { %1074 = vmatmul.msk.f32.gmra.mxu1 %vm247_vm3, %v1070_v47 }
  0xee   : > { %1097 = vmatmul.msk.f32.gmra.mxu0 %vm247_vm3, %v1093_v48  ;;  %1091 = vmatmul.msk.f32.gmra.mxu3 %vm247_vm3, %v1087_v49 }
  0xf4   : > { %1075 = vmatmul.msk.f32.gmra.mxu1 %vm247_vm3, %v1071_v50 }
  0xf6   : > { %1098 = vmatmul.msk.f32.gmra.mxu0 %vm247_vm3, %v1094_v51 }
  0xfe   : > { %1099 = vmatmul.msk.f32.gmra.mxu0 %vm247_vm3, %v1095_v52 }
 0x11a   : > { %v858_v28 = vpop.permute.xlu2 %857 }
 0x11f   : > { %v280_v54 = vpop.f32.mrf.mxu1 }
 0x121   : > { %v277_v58 = vpop.f32.mrf.mxu0 }
 0x124   : > { %v283_v53 = vpop.f32.mrf.mxu2  ;;  %v286_v55 = vpop.f32.mrf.mxu3 }
 0x127   : > { %v318_v57 = vpop.f32.mrf.mxu1 }
 0x128   : > { %v319_v2 = vadd.f32 %v318_v57, %v277_v58 }
 0x12f   : > { %v389_v56 = vpop.f32.mrf.mxu2  ;;  %v321_v61 = vpop.f32.mrf.mxu1 }
 0x130   : > { %v401_v6 = vadd.f32 %v389_v56, %v319_v2  ;;  %v322_v12 = vadd.f32 %v321_v61, %v280_v54  ;;  %v863_v45 = vpop.permute.xlu0 %862 }
 0x131   : > { %v868_v57 = vpop.permute.xlu1 %867 }
 0x132   : > { %v464_v59 = vpop.f32.mrf.mxu3 }
 0x133   : > { %v476_v10 = vadd.f32 %v464_v59, %v401_v6 }
 0x137   : > { %v392_v60 = vpop.f32.mrf.mxu2  ;;  %v324_v1 = vpop.f32.mrf.mxu1 }
 0x138   : > { %v402_v16 = vadd.f32 %v392_v60, %v322_v12  ;;  %v325_v23 = vadd.f32 %v324_v1, %v283_v53 }
 0x139   : > { %v539_v62 = vpop.f32.mrf.mxu0 }
 0x13a   : > { %v467_v63 = vpop.f32.mrf.mxu3  ;;  %v551_v13 = vadd.f32 %v539_v62, %v476_v10 }
 0x13b   : > { %v477_v19 = vadd.f32 %v467_v63, %v402_v16 }
 0x13f   : > { %v327_v7 = vpop.f32.mrf.mxu1 }
 0x140   : > { %v395_v0 = vpop.f32.mrf.mxu2  ;;  %v328_v36 = vadd.f32 %v327_v7, %v286_v55 }
 0x141   : > { %v542_v3 = vpop.f32.mrf.mxu0  ;;  %v403_v25 = vadd.f32 %v395_v0, %v325_v23 }
 0x142   : > { %v470_v4 = vpop.f32.mrf.mxu3  ;;  %v552_v22 = vadd.f32 %v542_v3, %v477_v19 }
 0x143   : > { %v478_v32 = vadd.f32 %v470_v4, %v403_v25 }
 0x148   : > { %v398_v5 = vpop.f32.mrf.mxu2 }
 0x149   : > { %v545_v8 = vpop.f32.mrf.mxu0  ;;  %v404_v40 = vadd.f32 %v398_v5, %v328_v36  ;;  %v873_v5 = vpop.permute.xlu2 %872 }
 0x14a   : > { %v473_v9 = vpop.f32.mrf.mxu3  ;;  %v553_v35 = vadd.f32 %v545_v8, %v478_v32 }
 0x14b   : > { %v479_v48 = vadd.f32 %v473_v9, %v404_v40 }
 0x150   : > { %v689_v11 = vpop.f32.mrf.mxu2 }
 0x151   : > { %v548_v18 = vpop.f32.mrf.mxu0 }
 0x152   : > { %v554_v51 = vadd.f32 %v548_v18, %v479_v48 }
 0x158   : > { %v692_v21 = vpop.f32.mrf.mxu2 }
 0x159   : > { %v614_v14 = vpop.f32.mrf.mxu1  ;;  %v764_v15 = vpop.f32.mrf.mxu3 }
 0x15a   : > { %v626_v17 = vadd.f32 %v614_v14, %v551_v13 }
 0x15c   : > { %v701_v20 = vadd.f32 %v689_v11, %v626_v17 }
 0x15e   : > { %v776_v26 = vadd.f32 %v764_v15, %v701_v20 }
 0x160   : > { %v695_v39 = vpop.f32.mrf.mxu2 }
 0x161   : > { %v617_v24 = vpop.f32.mrf.mxu1  ;;  %v767_v30 = vpop.f32.mrf.mxu3 }
 0x162   : > { %v627_v27 = vadd.f32 %v617_v24, %v552_v22 }
 0x163   : > { %v839_v29 = vpop.f32.mrf.mxu0 }
 0x164   : > { %v851_v31 = vadd.f32 %v839_v29, %v776_v26  ;;  %v702_v33 = vadd.f32 %v692_v21, %v627_v27 }
 0x166   : > { %v875_v34 = vadd.f32 %v858_v28, %v851_v31  ;;  %v777_v42 = vadd.f32 %v767_v30, %v702_v33 }
 0x168   : > { %vm879_vm9 = vcmp.ge.f32.partialorder %v875_v34, 0.0  ;;  %v883_v37 = vmul.f32 0.01, %v875_v34  ;;  %v698_v58 = vpop.f32.mrf.mxu2 }
 0x169   : > { %v620_v38 = vpop.f32.mrf.mxu1  ;;  %v770_v47 = vpop.f32.mrf.mxu3 }
 0x16a   : > { %v887_v41 = vsel %vm879_vm9, %v875_v34, %v883_v37  ;;  %v628_v43 = vadd.f32 %v620_v38, %v553_v35 }
 0x16b   : > { %891 = vst [vmem:[%s1714_s4] sm:$0xff] %v887_v41  ;;  %v842_v44 = vpop.f32.mrf.mxu0 }
 0x16c   : > { %v852_v46 = vadd.f32 %v842_v44, %v777_v42  ;;  %v703_v49 = vadd.f32 %v695_v39, %v628_v43 }
 0x16e   : > { %v876_v50 = vadd.f32 %v863_v45, %v852_v46  ;;  %v778_v55 = vadd.f32 %v770_v47, %v703_v49 }
 0x170   : > { %vm880_vm10 = vcmp.ge.f32.partialorder %v876_v50, 0.0  ;;  %v884_v52 = vmul.f32 0.01, %v876_v50 }
 0x171   : > { %v623_v53 = vpop.f32.mrf.mxu1  ;;  %v773_v63 = vpop.f32.mrf.mxu3 }
 0x172   : > { %v888_v54 = vsel %vm880_vm10, %v876_v50, %v884_v52  ;;  %v629_v56 = vadd.f32 %v623_v53, %v554_v51  ;;  %v940_v9 = vld [vmem:[%s1714_s4] sm:$0xff] (%p1477_p5) }
 0x173   : > { %892 = vst [vmem:[%s1714_s4 + $0x8] sm:$0xff] %v888_v54  ;;  %v845_v59 = vpop.f32.mrf.mxu0 }
 0x174   : > { %v853_v60 = vadd.f32 %v845_v59, %v778_v55  ;;  %v704_v61 = vadd.f32 %v698_v58, %v629_v56  ;;  %941 = vst [vmem:[%s905_s9] sm:$0xff] (%p1477_p5), %v940_v9 }
 0x176   : > { %v877_v62 = vadd.f32 %v868_v57, %v853_v60  ;;  %v779_v3 = vadd.f32 %v773_v63, %v704_v61 }
 0x178   : > { %vm881_vm11 = vcmp.ge.f32.partialorder %v877_v62, 0.0  ;;  %v885_v0 = vmul.f32 0.01, %v877_v62 }
 0x17a   : > { %v889_v1 = vsel %vm881_vm11, %v877_v62, %v885_v0  ;;  %v942_v10 = vld [vmem:[%s1714_s4 + $0x8] sm:$0xff] (%p1477_p5) }
 0x17b   : > { %893 = vst [vmem:[%s1714_s4 + $0x10] sm:$0xff] %v889_v1  ;;  %v848_v4 = vpop.f32.mrf.mxu0 }
 0x17c   : > { %v854_v2 = vadd.f32 %v848_v4, %v779_v3  ;;  %943 = vst [vmem:[%s905_s9 + $0x18] sm:$0xff] (%p1477_p5), %v942_v10 }
 0x17e   : > { %v878_v6 = vadd.f32 %v873_v5, %v854_v2 }
 0x17f   : > { %901 = sbr.rel (!%p1477_p5) target bundleno = 396 (0x18c), region = 36 }
 0x180   : > { %vm882_vm12 = vcmp.ge.f32.partialorder %v878_v6, 0.0  ;;  %v886_v7 = vmul.f32 0.01, %v878_v6 }
 0x182   : > { %v890_v8 = vsel %vm882_vm12, %v878_v6, %v886_v7  ;;  %v944_v11 = vld [vmem:[%s1714_s4 + $0x10] sm:$0xff] (%p1477_p5) }
 0x183   : > { %894 = vst [vmem:[%s1714_s4 + $0x18] sm:$0xff] %v890_v8 }
 0x184   : > { %945 = vst [vmem:[%s905_s9 + $0x30] sm:$0xff] %v944_v11 }
 0x18a   : > { %v946_v12 = vld [vmem:[%s1714_s4 + $0x18] sm:$0xff] }
 0x18b   : > { %947 = vst [vmem:[%s905_s9 + $0x48] sm:$0xff] %v946_v12 }
 0x18c PF: > { %s13_s18 = sadd.s32 1, %s1400_s18   ;;  %s1757_s12 = smov %s1380_s13 }
 0x18d   : > { %p10_p11 = scmp.ge.s32.totalorder %s13_s18, 8   ;;  %s1758_s13 = smov %s1488_s27 }
 0x18e   : > { %s1759_s14 = smov %s1392_s16  ;;  %s1760_s15 = smov %s1396_s17 }
 0x18f   : > { %s1761_s16 = smov %s1764_s19  ;;  %s1762_s17 = smov %s1768_s20 }
 0x190   :  { %12 = sbr.rel (!%p10_p11) target bundleno = 4 (0x4), region = 108 }

// kernel: basic_stem_forward.5
= control target key start
LH: loop header
LB: loop body
LE: loop exit
PB: predicated region body
PF: predicated region fallthrough
CT: control target
= control target key end

     0   :  { %s1815_s12 = smov 0   ;;  %s1817_s13 = smov 0   ;;  %s2373_s0 = inlined_call_operand.vmem [shape: f32[2,3,32,166], index: 0, kind: input, shape index: {}]   ;;  %s2374_s1 = inlined_call_operand.vmem [shape: f32[9,64,32], index: 1, kind: input, shape index: {}]   ;;  %s2375_s2 = inlined_call_operand.vmem [shape: f32[64,1], index: 2, kind: input, shape index: {}]   ;;  %s2376_s3 = inlined_call_operand.vmem [shape: f32[2,64,384], index: 3, kind: output, shape index: {}]  }
   0x1   :  { %s1819_s14 = smov 0   ;;  %s1821_s15 = smov 0  }
   0x2   :  { %s1823_s16 = smov 0   ;;  %s1825_s17 = smov 0  }
   0x3   :  { %s1827_s18 = smov 0  }
   0x4 LB: > { %s22_s19 = sadd.s32 1, %s1776_s16  ;;  %s25_s20 = sadd.s32 1, %s1780_s17  ;;  %s1784_s18 = sphi %s1827_s18, %s13_s18   ;;  %s1780_s17 = sphi %s1825_s17, %s2383_s17   ;;  %s1776_s16 = sphi %s1823_s16, %s2382_s16   ;;  %s1772_s15 = sphi %s1821_s15, %s2381_s15   ;;  %s1768_s14 = sphi %s1819_s14, %s2380_s14   ;;  %s1764_s13 = sphi %s1817_s13, %s2379_s13   ;;  %s1760_s12 = sphi %s1815_s12, %s2378_s12  }
   0x5   : > { %p23_p0 = scmp.ge.s32.totalorder %s22_s19, 3  ;;  %s1340_s21 = sadd.s32 4294967295, %s1784_s18  }
   0x6   : > { %p114_p1 = scmp.ne.s32.totalorder %s1764_s13, %s1760_s12  ;;  %p115_p2 = scmp.eq.s32.totalorder %s1340_s21, 5 }
   0x7   : > { %s2385_s19 = smov (%p23_p0, %s22_s19), 0  ;;  %s2387_s20 = smov (!%p23_p0, %s25_s20), %s1780_s17 }
   0x8   : > { %s100_s22 = ssub.s32 %s1776_s16, %s2385_s19  ;;  %p27_p3 = scmp.ge.s32.totalorder %s2387_s20, 2 }
   0x9   : > { %p1344_p4 = scmp.ge.s32.totalorder %s1784_s18, 1  ;;  %p1861_p5 = por %p115_p2, %p114_p1 }
   0xa   : > { %p157_p6 = scmp.lt.s32.totalorder %s1784_s18, 7  ;;  %s2389_s20 = smov (%p27_p3, %s2387_s20), 0 }
   0xb   : > { %s99_s24 = ssub.s32 %s1780_s17, %s2389_s20  ;;  %s104_s26 = sadd.s32 1, %s1764_s13 }
   0xc   : > { %p158_p7 = pnand %p1344_p4, %p157_p6  ;;  %s101_s25 = sor.u32 %s100_s22, %s99_s24 }
   0xd   : > { %p102_p8 = scmp.eq.s32.totalorder %s101_s25, 0  ;;  %p184_p9 = scmp.lt.s32.totalorder (!%p158_p7), %s1772_s15, 1 }
   0xe   : > { %161 = sbr.rel (%p158_p7) target bundleno = 448 (0x1c0), region = 32  ;;  %p186_p10 = scmp.lt.s32.totalorder (!%p158_p7), %s1768_s14, 2 }
   0xf   : > { %s1872_s27 = scalar_select %p102_p8, %s1764_s13, %s104_s26  }
  0x10   : > { %s1786_s10 = smov (!%p158_p7), 127   ;;  %s1787_s11 = smov (!%p158_p7), 126  }
  0x11   : > { %s1788_s21 = smov (!%p158_p7), 110   ;;  %s1789_s22 = smov (!%p158_p7), 109  }
  0x12   : > { %s1790_s24 = smov (!%p158_p7), 92   ;;  %s1791_s25 = smov (!%p158_p7), 91  }
  0x13   : > { %s185_s28 = scalar_select %p184_p9, %s1772_s15, 1  ;;  %vm250_vm0 = vcmask 1039360   ;;  %v1350_v37 = vld [vmem:[%s2374_s1 + $0x50] sm:$0xff]  ;;  %vm259_vm1 = vcmask 261120   ;;  %v1352_v38 = vld [vmem:[%s2374_s1 + $0x60] sm:$0xff]  ;;  %vm415_vm2 = vcmask 1031168  }
  0x14   : > { %s187_s29 = scalar_select %p186_p10, %s1768_s14, 2  ;;  %v1354_v42 = vld [vmem:[%s2374_s1 + $0x70] sm:$0xff]  ;;  %vm522_vm3 = vcmask 900096   ;;  %v1348_v50 = vld [vmem:[%s2374_s1 + $0x40] sm:$0xff]  ;;  %v1351_v55 = vld [vmem:[%s2374_s1 + $0x58] sm:$0xff]  ;;  %vm629_vm4 = vcmask 891904  }
  0x15   : > { %s1500_s30 = smul.u32 24, %s185_s28  ;;  %s1792_s26 = smov 108   ;;  %v1353_v56 = vld [vmem:[%s2374_s1 + $0x68] sm:$0xff]  ;;  %v1355_v58 = vld [vmem:[%s2374_s1 + $0x78] sm:$0xff]  ;;  %vm843_vm5 = vcmask 752640   ;;  %vm950_vm6 = vcmask 744448  }
  0x16   : > { %s1346_s4 = sshll.u32 %s187_s29, 3  ;;  %s1793_s28 = smov 90   ;;  %vm736_vm7 = vcmask 883712   ;;  %vm1057_vm8 = vcmask 736256  }
  0x17   : > { %s190_s5 = sadd.s32 %s1500_s30, %s1346_s4  ;;  %s181_s29 = sand.u32 1, %s1760_s12  }
  0x18   : > { %s1347_s6 = sshll.u32 %s190_s5, 3  ;;  %s1345_s30 = sshll.u32 %s181_s29, 6 }
  0x19   : > { %s192_s9 = scalar_lea.vmem %s2373_s0, %s1347_s6  ;;  %s2305_s4 = scalar_lea.vmem [#allocation2], %s1345_s30 }
  0x1a   : > { %v1881_v0 = vld [vmem:[%s192_s9 + $0x30] sm:$0xff]  ;;  %v216_v1 = vld [vmem:[%s192_s9 + $0x38] sm:$0xff]  ;;  %v1887_v6 = vld [vmem:[%s192_s9 + $0x20] sm:$0xff]  ;;  %s1501_s12 = smul.u32 (%p1861_p5), 24, %s1772_s15 }
  0x1b   : > { %v1883_v2 = vld [vmem:[%s192_s9 + $0x10] sm:$0xff]  ;;  %v1567_v3 = vpack.i.bf16 %v216_v1, %v1881_v0  ;;  %v214_v4 = vld [vmem:[%s192_s9 + $0x18] sm:$0xff]  ;;  %v215_v7 = vld [vmem:[%s192_s9 + $0x28] sm:$0xff] }
  0x1c   : > { %v1577_v5 = vpack.i.bf16 %v214_v4, %v1883_v2  ;;  %v1889_v8 = vld [vmem:[%s192_s9] sm:$0xff]  ;;  %v213_v9 = vld [vmem:[%s192_s9 + $0x8] sm:$0xff]  ;;  %v1572_v10 = vpack.i.bf16 %v215_v7, %v1887_v6  ;;  %s1203_s5 = sadd.s32 (%p1861_p5), %s1768_s14, %s1501_s12 }
  0x1d   : > { %1568 = vrot.lane.b32.xlu0 %v1567_v3, %s1786_s10  ;;  %1588 = vrot.lane.b32.xlu2 %v1567_v3, %s1787_s11  ;;  %v1582_v11 = vpack.i.bf16 %v213_v9, %v1889_v8  ;;  %v1372_v7 = vld [vmem:[%s2374_s1 + $0x80] sm:$0xff]  ;;  %s1485_s6 = sshll.u32 (%p1861_p5), %s1203_s5, 3 }
  0x1e   : > { %1578 = vrot.lane.b32.xlu1 %v1577_v5, %s1786_s10  ;;  %s1205_s23 = scalar_lea.vmem (%p1861_p5), %s2376_s3, %s1485_s6 }
  0x25   : > { %1573 = vrot.lane.b32.xlu0 %v1572_v10, %s1786_s10  ;;  %1593 = vrot.lane.b32.xlu2 %v1572_v10, %s1787_s11 }
  0x26   : > { %1583 = vrot.lane.b32.xlu1 %v1582_v11, %s1786_s10 }
  0x2d   : > { %1598 = vrot.lane.b32.xlu0 %v1567_v3, %s1788_s21  ;;  %1608 = vrot.lane.b32.xlu2 %v1572_v10, %s1788_s21 }
  0x2e   : > { %1603 = vrot.lane.b32.xlu1 %v1577_v5, %s1787_s11 }
  0x35   : > { %1613 = vrot.lane.b32.xlu0 %v1582_v11, %s1787_s11  ;;  %1623 = vrot.lane.b32.xlu2 %v1582_v11, %s1788_s21 }
  0x36   : > { %1618 = vrot.lane.b32.xlu1 %v1577_v5, %s1788_s21 }
  0x3d   : > { %1628 = vrot.lane.b32.xlu0 %v1567_v3, %s1789_s22  ;;  %1638 = vrot.lane.b32.xlu2 %v1577_v5, %s1789_s22 }
  0x3e   : > { %1633 = vrot.lane.b32.xlu1 %v1572_v10, %s1789_s22 }
  0x45   : > { %1643 = vrot.lane.b32.xlu0 %v1582_v11, %s1789_s22  ;;  %1653 = vrot.lane.b32.xlu2 %v1572_v10, %s1790_s24 }
  0x46   : > { %1648 = vrot.lane.b32.xlu1 %v1567_v3, %s1790_s24 }
  0x4d   : > { %1658 = vrot.lane.b32.xlu0 %v1567_v3, %s1791_s25  ;;  %1668 = vrot.lane.b32.xlu2 %v1577_v5, %s1790_s24 }
  0x4e   : > { %1663 = vrot.lane.b32.xlu1 %v1567_v3, %s1792_s26 }
  0x55   : > { %1673 = vrot.lane.b32.xlu0 %v1572_v10, %s1791_s25  ;;  %1683 = vrot.lane.b32.xlu2 %v1582_v11, %s1790_s24 }
  0x56   : > { %1678 = vrot.lane.b32.xlu1 %v1572_v10, %s1792_s26 }
  0x5d   : > { %1688 = vrot.lane.b32.xlu0 %v1577_v5, %s1791_s25  ;;  %1698 = vrot.lane.b32.xlu2 %v1582_v11, %s1791_s25 }
  0x5e   : > { %1693 = vrot.lane.b32.xlu1 %v1577_v5, %s1792_s26 }
  0x65   : > { %1703 = vrot.lane.b32.xlu0 %v1582_v11, %s1792_s26  ;;  %1713 = vrot.lane.b32.xlu2 %v1572_v10, %s1793_s28  ;;  %v1388_v10 = vld [vmem:[%s2374_s1 + $0xc0] sm:$0xff] }
  0x66   : > { %1708 = vrot.lane.b32.xlu1 %v1567_v3, %s1793_s28  ;;  %v1349_v3 = vld [vmem:[%s2374_s1 + $0x48] sm:$0xff] }
  0x6d   : > { %1718 = vrot.lane.b32.xlu0 %v1577_v5, %s1793_s28 }
  0x6e   : > { %1723 = vrot.lane.b32.xlu1 %v1582_v11, %s1793_s28 }
  0x77   : > { %v1589_v12 = vpop.permute.xlu2 %1588 }
  0x78   : > { %v1591_v33 = vunpack.i.h.bf16 %v1589_v12  ;;  %v1590_v34 = vunpack.i.l.bf16 %v1589_v12 }
  0x7a   : > { %v419_v48 = vsel %vm415_vm2, %v1590_v34, %v1591_v33  ;;  %v1404_v33 = vld [vmem:[%s2374_s1 + $0x100] sm:$0xff] }
  0x7f   : > { %v1594_v13 = vpop.permute.xlu2 %1593 }
  0x80   : > { %v1596_v35 = vunpack.i.h.bf16 %v1594_v13  ;;  %v1595_v36 = vunpack.i.l.bf16 %v1594_v13 }
  0x82   : > { %v418_v49 = vsel %vm415_vm2, %v1595_v36, %v1596_v35 }
  0x87   : > { %v1893_v14 = vpop.permute.xlu2 %1608 }
  0x88   : > { %v1611_v39 = vunpack.i.h.bf16 %v1893_v14  ;;  %v1610_v40 = vunpack.i.l.bf16 %v1893_v14 }
  0x8a   : > { %v525_v52 = vsel %vm522_vm3, %v1610_v40, %v1611_v39 }
  0x8f   : > { %v1569_v15 = vpop.permute.xlu0 %1568  ;;  %v1896_v20 = vpop.permute.xlu2 %1623 }
  0x90   : > { %v1571_v16 = vunpack.i.h.bf16 %v1569_v15  ;;  %v1570_v17 = vunpack.i.l.bf16 %v1569_v15  ;;  %v1579_v18 = vpop.permute.xlu1 %1578  ;;  %v1626_v59 = vunpack.i.h.bf16 %v1896_v20  ;;  %v1625_v60 = vunpack.i.l.bf16 %v1896_v20 }
  0x91   : > { %v1581_v22 = vunpack.i.h.bf16 %v1579_v18  ;;  %v1580_v23 = vunpack.i.l.bf16 %v1579_v18 }
  0x92   : > { %v254_v19 = vsel %vm250_vm0, %v1570_v17, %v1571_v16  ;;  %v523_v5 = vsel %vm522_vm3, %v1625_v60, %v1626_v59 }
  0x93   : > { %296 = vmatpush.msra.mxu0 %v254_v19  ;;  %1488 = vmatpush.msra.mxu1 %v254_v19  ;;  %v252_v30 = vsel %vm250_vm0, %v1580_v23, %v1581_v22  ;;  %v1373_v22 = vld [vmem:[%s2374_s1 + $0x88] sm:$0xff] }
  0x94   : > { %1489 = vmatpush.msra.mxu2 %v254_v19  ;;  %1490 = vmatpush.msra.mxu3 %v254_v19 }
  0x97   : > { %v1574_v21 = vpop.permute.xlu0 %1573  ;;  %v1901_v32 = vpop.permute.xlu2 %1638 }
  0x98   : > { %v1576_v24 = vunpack.i.h.bf16 %v1574_v21  ;;  %v1575_v25 = vunpack.i.l.bf16 %v1574_v21  ;;  %v1584_v26 = vpop.permute.xlu1 %1583  ;;  %v1641_v14 = vunpack.i.h.bf16 %v1901_v32  ;;  %v1640_v15 = vunpack.i.l.bf16 %v1901_v32  ;;  %v206_v21 = vld [vmem:[%s2374_s1 + $0x8] sm:$0xff] }
  0x99   : > { %v1586_v27 = vunpack.i.h.bf16 %v1584_v26  ;;  %v1585_v28 = vunpack.i.l.bf16 %v1584_v26 }
  0x9a   : > { %v253_v29 = vsel %vm250_vm0, %v1575_v25, %v1576_v24  ;;  %v631_v20 = vsel %vm629_vm4, %v1640_v15, %v1641_v14  ;;  %v1389_v24 = vld [vmem:[%s2374_s1 + $0xc8] sm:$0xff]  ;;  %v1407_v15 = vld [vmem:[%s2374_s1 + $0x118] sm:$0xff] }
  0x9b   : > { %297 = vmatpush.msra.mxu0 %v253_v29  ;;  %1491 = vmatpush.msra.mxu1 %v253_v29  ;;  %v251_v31 = vsel %vm250_vm0, %v1585_v28, %v1586_v27 }
  0x9c   : > { %1492 = vmatpush.msra.mxu2 %v253_v29  ;;  %1493 = vmatpush.msra.mxu3 %v253_v29 }
  0x9d   : > { %298 = vmatpush.msra.mxu0 %v252_v30  ;;  %1494 = vmatpush.msra.mxu1 %v252_v30 }
  0x9e   : > { %1495 = vmatpush.msra.mxu2 %v252_v30  ;;  %1496 = vmatpush.msra.mxu3 %v252_v30 }
  0x9f   : > { %v1599_v41 = vpop.permute.xlu0 %1598  ;;  %299 = vmatpush.msra.mxu0 %v251_v31  ;;  %1497 = vmatpush.msra.mxu1 %v251_v31  ;;  %v1927_v54 = vpop.permute.xlu2 %1653 }
  0xa0   : > { %v1601_v43 = vunpack.i.h.bf16 %v1599_v41  ;;  %v1600_v44 = vunpack.i.l.bf16 %v1599_v41  ;;  %v1604_v45 = vpop.permute.xlu1 %1603  ;;  %1498 = vmatpush.msra.mxu2 %v251_v31  ;;  %1499 = vmatpush.msra.mxu3 %v251_v31  ;;  %v1656_v25 = vunpack.i.h.bf16 %v1927_v54  ;;  %v1655_v26 = vunpack.i.l.bf16 %v1927_v54 }
  0xa1   : > { %v1606_v46 = vunpack.i.h.bf16 %v1604_v45  ;;  %v1605_v47 = vunpack.i.l.bf16 %v1604_v45  ;;  %1358 = vmatmul.msk.f32.vlgmr.msra.gmra.mxu1 %vm259_vm1, %v1350_v37  ;;  %1360 = vmatmul.msk.f32.vlgmr.msra.gmra.mxu2 %vm259_vm1, %v1352_v38 }
  0xa2   : > { %460 = vmatpush.msrb.mxu2 %v419_v48  ;;  %1362 = vmatmul.msk.f32.vlgmr.msra.gmra.mxu3 %vm259_vm1, %v1354_v42  ;;  %v526_v51 = vsel %vm522_vm3, %v1600_v44, %v1601_v43  ;;  %v846_v38 = vsel %vm843_vm5, %v1655_v26, %v1656_v25  ;;  %v207_v42 = vld [vmem:[%s2374_s1 + $0x10] sm:$0xff] }
  0xa3   : > { %v417_v53 = vsel %vm415_vm2, %v1605_v47, %v1606_v46  ;;  %567 = vmatpush.msrb.mxu3 %v526_v51  ;;  %361 = vmatpush.msrb.mxu1 %v1881_v0  ;;  %v1374_v43 = vld [vmem:[%s2374_s1 + $0x90] sm:$0xff] }
  0xa4   : > { %461 = vmatpush.msrb.mxu2 %v418_v49  ;;  %1356 = vmatmul.msk.f32.vlgmr.msra.gmra.mxu0 %vm259_vm1, %v1348_v50  ;;  %v1390_v44 = vld [vmem:[%s2374_s1 + $0xd0] sm:$0xff] }
  0xa5   : > { %568 = vmatpush.msrb.mxu3 %v525_v52  ;;  %362 = vmatpush.msrb.mxu1 %v1887_v6  ;;  %v205_v6 = vld [vmem:[%s2374_s1] sm:$0xff]  ;;  %v1405_v52 = vld [vmem:[%s2374_s1 + $0x108] sm:$0xff] }
  0xa6   : > { %462 = vmatpush.msrb.mxu2 %v417_v53 }
  0xa7   : > { %v1614_v57 = vpop.permute.xlu0 %1613  ;;  %363 = vmatpush.msrb.mxu1 %v1883_v2 }
  0xa8   : > { %v1616_v61 = vunpack.i.h.bf16 %v1614_v57  ;;  %v1615_v62 = vunpack.i.l.bf16 %v1614_v57  ;;  %v1619_v63 = vpop.permute.xlu1 %1618  ;;  %v1391_v57 = vld [vmem:[%s2374_s1 + $0xd8] sm:$0xff] }
  0xa9   : > { %v1621_v0 = vunpack.i.h.bf16 %v1619_v63  ;;  %v1620_v1 = vunpack.i.l.bf16 %v1619_v63  ;;  %1359 = vmatmul.msk.f32.gmra.mxu1 %vm259_vm1, %v1351_v55  ;;  %1361 = vmatmul.msk.f32.gmra.mxu2 %vm259_vm1, %v1353_v56  ;;  %v208_v55 = vld [vmem:[%s2374_s1 + $0x18] sm:$0xff] }
  0xaa   : > { %1363 = vmatmul.msk.f32.gmra.mxu3 %vm259_vm1, %v1355_v58  ;;  %364 = vmatpush.msrb.mxu1 %v1889_v8  ;;  %v416_v4 = vsel %vm415_vm2, %v1615_v62, %v1616_v61  ;;  %v1669_v8 = vpop.permute.xlu2 %1668  ;;  %v1375_v56 = vld [vmem:[%s2374_s1 + $0x98] sm:$0xff] }
  0xab   : > { %v524_v2 = vsel %vm522_vm3, %v1620_v1, %v1621_v0  ;;  %463 = vmatpush.msrb.mxu2 %v416_v4  ;;  %v1671_v34 = vunpack.i.h.bf16 %v1669_v8  ;;  %v1670_v35 = vunpack.i.l.bf16 %v1669_v8  ;;  %v1406_v0 = vld [vmem:[%s2374_s1 + $0x110] sm:$0xff]  ;;  %v1392_v8 = vld [vmem:[%s2374_s1 + $0xe0] sm:$0xff] }
  0xac   : > { %569 = vmatpush.msrb.mxu3 %v524_v2  ;;  %1357 = vmatmul.msk.f32.gmra.mxu0 %vm259_vm1, %v1349_v3  ;;  %v209_v2 = vld [vmem:[%s2374_s1 + $0x20] sm:$0xff] }
  0xad   : > { %v845_v41 = vsel %vm843_vm5, %v1670_v35, %v1671_v34  ;;  %v211_v35 = vld [vmem:[%s2374_s1 + $0x30] sm:$0xff] }
  0xae   : > { %570 = vmatpush.msrb.mxu3 %v523_v5  ;;  %v1376_v5 = vld [vmem:[%s2374_s1 + $0xa0] sm:$0xff] }
  0xaf   : > { %v1629_v9 = vpop.permute.xlu0 %1628 }
  0xb0   : > { %v1631_v11 = vunpack.i.h.bf16 %v1629_v9  ;;  %v1630_v12 = vunpack.i.l.bf16 %v1629_v9  ;;  %v1634_v13 = vpop.permute.xlu1 %1633 }
  0xb1   : > { %v1636_v16 = vunpack.i.h.bf16 %v1634_v13  ;;  %v1635_v17 = vunpack.i.l.bf16 %v1634_v13  ;;  %1364 = vmatmul.msk.f32.vlgmr.msrb.gmra.mxu1 %vm259_vm1, %v205_v6  ;;  %1380 = vmatmul.msk.f32.vlgmr.msrb.gmra.mxu2 %vm259_vm1, %v1372_v7 }
  0xb2   : > { %1396 = vmatmul.msk.f32.vlgmr.msrb.gmra.mxu3 %vm259_vm1, %v1388_v10  ;;  %v633_v18 = vsel %vm629_vm4, %v1630_v12, %v1631_v11  ;;  %v1684_v30 = vpop.permute.xlu2 %1683 }
  0xb3   : > { %674 = vmatpush.msrb.mxu0 %v633_v18  ;;  %v632_v19 = vsel %vm629_vm4, %v1635_v17, %v1636_v16  ;;  %v1686_v39 = vunpack.i.h.bf16 %v1684_v30  ;;  %v1685_v40 = vunpack.i.l.bf16 %v1684_v30 }
  0xb5   : > { %675 = vmatpush.msrb.mxu0 %v632_v19  ;;  %v844_v46 = vsel %vm843_vm5, %v1685_v40, %v1686_v39 }
  0xb7   : > { %v1644_v23 = vpop.permute.xlu0 %1643  ;;  %676 = vmatpush.msrb.mxu0 %v631_v20  ;;  %v210_v20 = vld [vmem:[%s2374_s1 + $0x28] sm:$0xff] }
  0xb8   : > { %v1646_v27 = vunpack.i.h.bf16 %v1644_v23  ;;  %v1645_v28 = vunpack.i.l.bf16 %v1644_v23  ;;  %v1649_v29 = vpop.permute.xlu1 %1648 }
  0xb9   : > { %v1651_v31 = vunpack.i.h.bf16 %v1649_v29  ;;  %v1650_v32 = vunpack.i.l.bf16 %v1649_v29  ;;  %1365 = vmatmul.msk.f32.gmra.mxu1 %vm259_vm1, %v206_v21  ;;  %1381 = vmatmul.msk.f32.gmra.mxu2 %vm259_vm1, %v1373_v22  ;;  %v1377_v21 = vld [vmem:[%s2374_s1 + $0xa8] sm:$0xff] }
  0xba   : > { %1397 = vmatmul.msk.f32.gmra.mxu3 %vm259_vm1, %v1389_v24  ;;  %v630_v36 = vsel %vm629_vm4, %v1645_v28, %v1646_v27  ;;  %v1699_v1 = vpop.permute.xlu2 %1698  ;;  %v1393_v22 = vld [vmem:[%s2374_s1 + $0xe8] sm:$0xff] }
  0xbb   : > { %677 = vmatpush.msrb.mxu0 %v630_v36  ;;  %v847_v37 = vsel %vm843_vm5, %v1650_v32, %v1651_v31  ;;  %v1701_v6 = vunpack.i.h.bf16 %v1699_v1  ;;  %v1700_v7 = vunpack.i.l.bf16 %v1699_v1  ;;  %v1408_v31 = vld [vmem:[%s2374_s1 + $0x120] sm:$0xff]  ;;  %v1378_v36 = vld [vmem:[%s2374_s1 + $0xb0] sm:$0xff] }
  0xbc   : > { %888 = vmatpush.msra.mxu2 %v847_v37  ;;  %1412 = vmatmul.msk.f32.vlgmr.msrb.gmra.mxu0 %vm259_vm1, %v1404_v33  ;;  %v1394_v37 = vld [vmem:[%s2374_s1 + $0xf0] sm:$0xff]  ;;  %v193_v1 = vld [vmem:[%s2375_s2] sm:$0xff] }
  0xbd   : > { %v951_v17 = vsel %vm950_vm6, %v1700_v7, %v1701_v6  ;;  %v197_v6 = vld [vmem:[%s2375_s2 + $0x20] sm:$0xff]  ;;  %v1470_v7 = vld [vmem:[%s2374_s1 + $0x210] sm:$0xff] }
  0xbe   : > { %889 = vmatpush.msra.mxu2 %v846_v38 }
  0xbf   : > { %v1659_v45 = vpop.permute.xlu0 %1658 }
  0xc0   : > { %v1664_v47 = vpop.permute.xlu1 %1663  ;;  %v1661_v48 = vunpack.i.h.bf16 %v1659_v45  ;;  %v1660_v49 = vunpack.i.l.bf16 %v1659_v45  ;;  %890 = vmatpush.msra.mxu2 %v845_v41 }
  0xc1   : > { %v1666_v50 = vunpack.i.h.bf16 %v1664_v47  ;;  %v1665_v51 = vunpack.i.l.bf16 %v1664_v47  ;;  %1366 = vmatmul.msk.f32.gmra.mxu1 %vm259_vm1, %v207_v42  ;;  %1382 = vmatmul.msk.f32.gmra.mxu2 %vm259_vm1, %v1374_v43  ;;  %v212_v47 = vld [vmem:[%s2374_s1 + $0x38] sm:$0xff] }
  0xc2   : > { %1398 = vmatmul.msk.f32.gmra.mxu3 %vm259_vm1, %v1390_v44  ;;  %v954_v53 = vsel %vm950_vm6, %v1660_v49, %v1661_v48  ;;  %891 = vmatpush.msra.mxu2 %v844_v46  ;;  %v1714_v19 = vpop.permute.xlu2 %1713  ;;  %v1409_v44 = vld [vmem:[%s2374_s1 + $0x128] sm:$0xff]  ;;  %v1379_v48 = vld [vmem:[%s2374_s1 + $0xb8] sm:$0xff] }
  0xc3   : > { %v740_v54 = vsel %vm736_vm7, %v1665_v51, %v1666_v50  ;;  %995 = vmatpush.msra.mxu3 %v954_v53  ;;  %v1716_v23 = vunpack.i.h.bf16 %v1714_v19  ;;  %v1715_v24 = vunpack.i.l.bf16 %v1714_v19  ;;  %v1395_v49 = vld [vmem:[%s2374_s1 + $0xf8] sm:$0xff]  ;;  %v1410_v50 = vld [vmem:[%s2374_s1 + $0x130] sm:$0xff]  ;;  %v1420_v51 = vld [vmem:[%s2374_s1 + $0x140] sm:$0xff]  ;;  %v1794_v53 = vmov 0  }
  0xc4   : > { %781 = vmatpush.msra.mxu1 %v740_v54  ;;  %1413 = vmatmul.msk.f32.gmra.mxu0 %vm259_vm1, %v1405_v52  ;;  %v1436_v52 = vld [vmem:[%s2374_s1 + $0x180] sm:$0xff] }
  0xc5   : > { %v1060_v34 = vsel %vm1057_vm8, %v1715_v24, %v1716_v23  ;;  %1728 = vset.pattern.permute.xlu0 %v1794_v53  ;;  %1729 = vset.pattern.permute.xlu1 %v1794_v53  ;;  %v1452_v54 = vld [vmem:[%s2374_s1 + $0x1c0] sm:$0xff]  ;;  %v1473_v23 = vld [vmem:[%s2374_s1 + $0x228] sm:$0xff] }
  0xc6   : > { %1727 = vset.pattern.permute.xlu2 %v1794_v53 }
  0xc7   : > { %v1674_v58 = vpop.permute.xlu0 %1673  ;;  %1141 = vperm.xlu2 %1727, %v193_v1  }
  0xc8   : > { %v1679_v59 = vpop.permute.xlu1 %1678  ;;  %v1676_v60 = vunpack.i.h.bf16 %v1674_v58  ;;  %v1675_v61 = vunpack.i.l.bf16 %v1674_v58  ;;  %v1437_v58 = vld [vmem:[%s2374_s1 + $0x188] sm:$0xff] }
  0xc9   : > { %v1681_v62 = vunpack.i.h.bf16 %v1679_v59  ;;  %v1680_v63 = vunpack.i.l.bf16 %v1679_v59  ;;  %1367 = vmatmul.msk.f32.gmra.mxu1 %vm259_vm1, %v208_v55  ;;  %1383 = vmatmul.msk.f32.gmra.mxu2 %vm259_vm1, %v1375_v56  ;;  %v194_v55 = vld [vmem:[%s2375_s2 + $0x8] sm:$0xff]  ;;  %v1411_v56 = vld [vmem:[%s2374_s1 + $0x138] sm:$0xff] }
  0xca   : > { %1399 = vmatmul.msk.f32.gmra.mxu3 %vm259_vm1, %v1391_v57  ;;  %v953_v3 = vsel %vm950_vm6, %v1675_v61, %v1676_v60  ;;  %1146 = vperm.xlu0 %1728, %v194_v55   ;;  %v1421_v57 = vld [vmem:[%s2374_s1 + $0x148] sm:$0xff]  ;;  %v195_v60 = vld [vmem:[%s2375_s2 + $0x10] sm:$0xff]  ;;  %v1468_v61 = vld [vmem:[%s2374_s1 + $0x200] sm:$0xff] }
  0xcb   : > { %v739_v4 = vsel %vm736_vm7, %v1680_v63, %v1681_v62  ;;  %996 = vmatpush.msra.mxu3 %v953_v3  ;;  %v1453_v59 = vld [vmem:[%s2374_s1 + $0x1c8] sm:$0xff]  ;;  %1151 = vperm.xlu1 %1729, %v195_v60   ;;  %v1422_v62 = vld [vmem:[%s2374_s1 + $0x150] sm:$0xff] }
  0xcc   : > { %782 = vmatpush.msra.mxu1 %v739_v4  ;;  %1414 = vmatmul.msk.f32.gmra.mxu0 %vm259_vm1, %v1406_v0  ;;  %v1438_v63 = vld [vmem:[%s2374_s1 + $0x190] sm:$0xff]  ;;  %v1469_v3 = vld [vmem:[%s2374_s1 + $0x208] sm:$0xff]  ;;  %v1423_v4 = vld [vmem:[%s2374_s1 + $0x158] sm:$0xff] }
  0xcd   : > { %v1454_v0 = vld [vmem:[%s2374_s1 + $0x1d0] sm:$0xff] }
  0xcf   : > { %v1689_v9 = vpop.permute.xlu0 %1688 }
  0xd0   : > { %v1694_v10 = vpop.permute.xlu1 %1693  ;;  %v1691_v11 = vunpack.i.h.bf16 %v1689_v9  ;;  %v1690_v12 = vunpack.i.l.bf16 %v1689_v9  ;;  %v1440_v9 = vld [vmem:[%s2374_s1 + $0x1a0] sm:$0xff] }
  0xd1   : > { %v1696_v13 = vunpack.i.h.bf16 %v1694_v10  ;;  %v1695_v14 = vunpack.i.l.bf16 %v1694_v10  ;;  %1368 = vmatmul.msk.f32.gmra.mxu1 %vm259_vm1, %v209_v2  ;;  %1384 = vmatmul.msk.f32.gmra.mxu2 %vm259_vm1, %v1376_v5  ;;  %v1439_v2 = vld [vmem:[%s2374_s1 + $0x198] sm:$0xff]  ;;  %v1456_v10 = vld [vmem:[%s2374_s1 + $0x1e0] sm:$0xff] }
  0xd2   : > { %1400 = vmatmul.msk.f32.gmra.mxu3 %vm259_vm1, %v1392_v8  ;;  %v952_v16 = vsel %vm950_vm6, %v1690_v12, %v1691_v11  ;;  %v1455_v5 = vld [vmem:[%s2374_s1 + $0x1d8] sm:$0xff]  ;;  %v1424_v8 = vld [vmem:[%s2374_s1 + $0x160] sm:$0xff] }
  0xd3   : > { %v738_v18 = vsel %vm736_vm7, %v1695_v14, %v1696_v13  ;;  %997 = vmatpush.msra.mxu3 %v952_v16  ;;  %1161 = vperm.xlu1 %1729, %v197_v6   ;;  %v1471_v11 = vld [vmem:[%s2374_s1 + $0x218] sm:$0xff]  ;;  %v1425_v13 = vld [vmem:[%s2374_s1 + $0x168] sm:$0xff] }
  0xd4   : > { %783 = vmatpush.msra.mxu1 %v738_v18  ;;  %1415 = vmatmul.msk.f32.gmra.mxu0 %vm259_vm1, %v1407_v15  ;;  %v200_v12 = vld [vmem:[%s2375_s2 + $0x38] sm:$0xff]  ;;  %v1441_v14 = vld [vmem:[%s2374_s1 + $0x1a8] sm:$0xff]  ;;  %v1472_v18 = vld [vmem:[%s2374_s1 + $0x220] sm:$0xff] }
  0xd5   : > { %998 = vmatpush.msra.mxu3 %v951_v17  ;;  %v1457_v15 = vld [vmem:[%s2374_s1 + $0x1e8] sm:$0xff]  ;;  %v196_v16 = vld [vmem:[%s2375_s2 + $0x18] sm:$0xff]  ;;  %v199_v17 = vld [vmem:[%s2375_s2 + $0x30] sm:$0xff] }
  0xd6   : > { %1156 = vperm.xlu2 %1727, %v196_v16   ;;  %1171 = vperm.xlu0 %1728, %v199_v17  }
  0xd7   : > { %v1704_v25 = vpop.permute.xlu0 %1703 }
  0xd8   : > { %v1709_v26 = vpop.permute.xlu1 %1708  ;;  %v1706_v27 = vunpack.i.h.bf16 %v1704_v25  ;;  %v1705_v28 = vunpack.i.l.bf16 %v1704_v25 }
  0xd9   : > { %v1711_v29 = vunpack.i.h.bf16 %v1709_v26  ;;  %v1710_v30 = vunpack.i.l.bf16 %v1709_v26  ;;  %1369 = vmatmul.msk.f32.gmra.mxu1 %vm259_vm1, %v210_v20  ;;  %1385 = vmatmul.msk.f32.gmra.mxu2 %vm259_vm1, %v1377_v21  ;;  %v1426_v20 = vld [vmem:[%s2374_s1 + $0x170] sm:$0xff] }
  0xda   : > { %1401 = vmatmul.msk.f32.gmra.mxu3 %vm259_vm1, %v1393_v22  ;;  %v737_v32 = vsel %vm736_vm7, %v1705_v28, %v1706_v27  ;;  %v1442_v21 = vld [vmem:[%s2374_s1 + $0x1b0] sm:$0xff]  ;;  %v1427_v28 = vld [vmem:[%s2374_s1 + $0x178] sm:$0xff] }
  0xdb   : > { %v1061_v33 = vsel %vm1057_vm8, %v1710_v30, %v1711_v29  ;;  %784 = vmatpush.msra.mxu1 %v737_v32  ;;  %1176 = vperm.xlu1 %1729, %v200_v12   ;;  %v1458_v22 = vld [vmem:[%s2374_s1 + $0x1f0] sm:$0xff]  ;;  %v1443_v29 = vld [vmem:[%s2374_s1 + $0x1b8] sm:$0xff] }
  0xdc   : > { %1102 = vmatpush.msra.mxu0 %v1061_v33  ;;  %v1459_v30 = vld [vmem:[%s2374_s1 + $0x1f8] sm:$0xff]  ;;  %v1474_v32 = vld [vmem:[%s2374_s1 + $0x230] sm:$0xff] }
  0xdd   : > { %1416 = vmatmul.msk.f32.gmra.mxu0 %vm259_vm1, %v1408_v31  ;;  %v198_v31 = vld [vmem:[%s2375_s2 + $0x28] sm:$0xff] }
  0xde   : > { %1103 = vmatpush.msra.mxu0 %v1060_v34  ;;  %1166 = vperm.xlu2 %1727, %v198_v31  }
  0xdf   : > { %v1719_v38 = vpop.permute.xlu0 %1718 }
  0xe0   : > { %v1721_v39 = vunpack.i.h.bf16 %v1719_v38  ;;  %v1720_v40 = vunpack.i.l.bf16 %v1719_v38  ;;  %v1724_v41 = vpop.permute.xlu1 %1723 }
  0xe1   : > { %1370 = vmatmul.msk.f32.gmra.mxu1 %vm259_vm1, %v211_v35  ;;  %1386 = vmatmul.msk.f32.gmra.mxu2 %vm259_vm1, %v1378_v36  ;;  %v1726_v42 = vunpack.i.h.bf16 %v1724_v41  ;;  %v1725_v43 = vunpack.i.l.bf16 %v1724_v41 }
  0xe2   : > { %1402 = vmatmul.msk.f32.gmra.mxu3 %vm259_vm1, %v1394_v37  ;;  %v1059_v45 = vsel %vm1057_vm8, %v1720_v40, %v1721_v39  ;;  %v1475_v37 = vld [vmem:[%s2374_s1 + $0x238] sm:$0xff] }
  0xe3   : > { %1104 = vmatpush.msra.mxu0 %v1059_v45  ;;  %v1058_v46 = vsel %vm1057_vm8, %v1725_v43, %v1726_v42 }
  0xe5   : > { %1417 = vmatmul.msk.f32.gmra.mxu0 %vm259_vm1, %v1409_v44 }
  0xe6   : > { %1105 = vmatpush.msra.mxu0 %v1058_v46 }
  0xe9   : > { %1371 = vmatmul.msk.f32.gmra.mxu1 %vm259_vm1, %v212_v47  ;;  %1387 = vmatmul.msk.f32.gmra.mxu2 %vm259_vm1, %v1379_v48 }
  0xea   : > { %1403 = vmatmul.msk.f32.gmra.mxu3 %vm259_vm1, %v1395_v49 }
  0xed   : > { %1418 = vmatmul.msk.f32.gmra.mxu0 %vm259_vm1, %v1410_v50 }
  0xf1   : > { %1428 = vmatmul.msk.f32.vlgmr.msra.gmra.mxu1 %vm259_vm1, %v1420_v51  ;;  %1444 = vmatmul.msk.f32.vlgmr.msra.gmra.mxu2 %vm259_vm1, %v1436_v52 }
  0xf2   : > { %1460 = vmatmul.msk.f32.vlgmr.msra.gmra.mxu3 %vm259_vm1, %v1452_v54 }
  0xf5   : > { %1419 = vmatmul.msk.f32.gmra.mxu0 %vm259_vm1, %v1411_v56 }
  0xf9   : > { %1429 = vmatmul.msk.f32.gmra.mxu1 %vm259_vm1, %v1421_v57  ;;  %1445 = vmatmul.msk.f32.gmra.mxu2 %vm259_vm1, %v1437_v58 }
  0xfa   : > { %1461 = vmatmul.msk.f32.gmra.mxu3 %vm259_vm1, %v1453_v59 }
  0xfd   : > { %1476 = vmatmul.msk.f32.vlgmr.msra.gmra.mxu0 %vm259_vm1, %v1468_v61 }
 0x101   : > { %1430 = vmatmul.msk.f32.gmra.mxu1 %vm259_vm1, %v1422_v62  ;;  %1446 = vmatmul.msk.f32.gmra.mxu2 %vm259_vm1, %v1438_v63 }
 0x102   : > { %1462 = vmatmul.msk.f32.gmra.mxu3 %vm259_vm1, %v1454_v0 }
 0x105   : > { %1477 = vmatmul.msk.f32.gmra.mxu0 %vm259_vm1, %v1469_v3 }
 0x109   : > { %1431 = vmatmul.msk.f32.gmra.mxu1 %vm259_vm1, %v1423_v4  ;;  %1447 = vmatmul.msk.f32.gmra.mxu2 %vm259_vm1, %v1439_v2 }
 0x10a   : > { %1463 = vmatmul.msk.f32.gmra.mxu3 %vm259_vm1, %v1455_v5 }
 0x10d   : > { %1478 = vmatmul.msk.f32.gmra.mxu0 %vm259_vm1, %v1470_v7 }
 0x111   : > { %1432 = vmatmul.msk.f32.gmra.mxu1 %vm259_vm1, %v1424_v8  ;;  %1448 = vmatmul.msk.f32.gmra.mxu2 %vm259_vm1, %v1440_v9 }
 0x112   : > { %1464 = vmatmul.msk.f32.gmra.mxu3 %vm259_vm1, %v1456_v10 }
 0x115   : > { %1479 = vmatmul.msk.f32.gmra.mxu0 %vm259_vm1, %v1471_v11 }
 0x119   : > { %1433 = vmatmul.msk.f32.gmra.mxu1 %vm259_vm1, %v1425_v13  ;;  %1449 = vmatmul.msk.f32.gmra.mxu2 %vm259_vm1, %v1441_v14 }
 0x11a   : > { %1465 = vmatmul.msk.f32.gmra.mxu3 %vm259_vm1, %v1457_v15 }
 0x11d   : > { %1480 = vmatmul.msk.f32.gmra.mxu0 %vm259_vm1, %v1472_v18 }
 0x11e   : > { %v2218_v19 = vpop.f32.mrf.mxu1 }
 0x121   : > { %1434 = vmatmul.msk.f32.gmra.mxu1 %vm259_vm1, %v1426_v20  ;;  %1450 = vmatmul.msk.f32.gmra.mxu2 %vm259_vm1, %v1442_v21  ;;  %v301_v26 = vpop.f32.mrf.mxu0 }
 0x122   : > { %1466 = vmatmul.msk.f32.gmra.mxu3 %vm259_vm1, %v1458_v22 }
 0x124   : > { %v2235_v24 = vpop.f32.mrf.mxu2 }
 0x125   : > { %1481 = vmatmul.msk.f32.gmra.mxu0 %vm259_vm1, %v1473_v23  ;;  %v2238_v25 = vpop.f32.mrf.mxu3  ;;  %v1142_v23 = vpop.permute.xlu2 %1141 }
 0x126   : > { %v2240_v27 = vpop.f32.mrf.mxu1 }
 0x129   : > { %1435 = vmatmul.msk.f32.gmra.mxu1 %vm259_vm1, %v1427_v28  ;;  %1451 = vmatmul.msk.f32.gmra.mxu2 %vm259_vm1, %v1443_v29  ;;  %v304_v36 = vpop.f32.mrf.mxu0 }
 0x12a   : > { %1467 = vmatmul.msk.f32.gmra.mxu3 %vm259_vm1, %v1459_v30 }
 0x12c   : > { %v2260_v33 = vpop.f32.mrf.mxu2 }
 0x12d   : > { %1482 = vmatmul.msk.f32.gmra.mxu0 %vm259_vm1, %v1474_v32  ;;  %v2263_v34 = vpop.f32.mrf.mxu3 }
 0x12e   : > { %v366_v35 = vpop.f32.mrf.mxu1 }
 0x12f   : > { %v367_v1 = vadd.f32 %v366_v35, %v301_v26 }
 0x134   : > { %v465_v38 = vpop.f32.mrf.mxu2 }
 0x135   : > { %1483 = vmatmul.msk.f32.gmra.mxu0 %vm259_vm1, %v1475_v37  ;;  %v572_v39 = vpop.f32.mrf.mxu3  ;;  %v489_v4 = vadd.f32 %v465_v38, %v367_v1 }
 0x136   : > { %v369_v40 = vpop.f32.mrf.mxu1 }
 0x137   : > { %v596_v7 = vadd.f32 %v572_v39, %v489_v4  ;;  %v370_v8 = vadd.f32 %v369_v40, %v304_v36 }
 0x139   : > { %v679_v41 = vpop.f32.mrf.mxu0 }
 0x13a   : > { %v703_v9 = vadd.f32 %v679_v41, %v596_v7 }
 0x13c   : > { %v468_v42 = vpop.f32.mrf.mxu2  ;;  %v1147_v41 = vpop.permute.xlu0 %1146 }
 0x13d   : > { %v575_v43 = vpop.f32.mrf.mxu3  ;;  %v490_v11 = vadd.f32 %v468_v42, %v370_v8  ;;  %v1152_v8 = vpop.permute.xlu1 %1151 }
 0x13e   : > { %v372_v44 = vpop.f32.mrf.mxu1 }
 0x13f   : > { %v597_v17 = vadd.f32 %v575_v43, %v490_v11  ;;  %v373_v18 = vadd.f32 %v372_v44, %v2218_v19 }
 0x141   : > { %v682_v45 = vpop.f32.mrf.mxu0 }
 0x142   : > { %v704_v20 = vadd.f32 %v682_v45, %v597_v17 }
 0x144   : > { %v471_v46 = vpop.f32.mrf.mxu2 }
 0x145   : > { %v578_v47 = vpop.f32.mrf.mxu3  ;;  %v491_v26 = vadd.f32 %v471_v46, %v373_v18  ;;  %v1157_v18 = vpop.permute.xlu2 %1156 }
 0x146   : > { %v375_v48 = vpop.f32.mrf.mxu1 }
 0x147   : > { %v598_v37 = vadd.f32 %v578_v47, %v491_v26  ;;  %v376_v19 = vadd.f32 %v375_v48, %v2240_v27 }
 0x149   : > { %v685_v49 = vpop.f32.mrf.mxu0 }
 0x14a   : > { %v705_v38 = vadd.f32 %v685_v49, %v598_v37 }
 0x14c   : > { %v474_v50 = vpop.f32.mrf.mxu2 }
 0x14d   : > { %v581_v51 = vpop.f32.mrf.mxu3  ;;  %v492_v42 = vadd.f32 %v474_v50, %v376_v19 }
 0x14e   : > { %v2269_v52 = vpop.f32.mrf.mxu1 }
 0x14f   : > { %v599_v47 = vadd.f32 %v581_v51, %v492_v42  ;;  %v379_v7 = vadd.f32 %v2269_v52, %v2235_v24 }
 0x151   : > { %v2271_v53 = vpop.f32.mrf.mxu0 }
 0x152   : > { %v706_v27 = vadd.f32 %v2271_v53, %v599_v47 }
 0x154   : > { %v2273_v54 = vpop.f32.mrf.mxu2 }
 0x155   : > { %v2275_v55 = vpop.f32.mrf.mxu3  ;;  %v493_v50 = vadd.f32 %v2273_v54, %v379_v7 }
 0x156   : > { %v2277_v56 = vpop.f32.mrf.mxu1 }
 0x157   : > { %v600_v51 = vadd.f32 %v2275_v55, %v493_v50  ;;  %v382_v24 = vadd.f32 %v2277_v56, %v2260_v33 }
 0x15a   : > { %v2279_v57 = vpop.f32.mrf.mxu0 }
 0x15b   : > { %v707_v52 = vadd.f32 %v2279_v57, %v600_v51 }
 0x15c   : > { %v2281_v58 = vpop.f32.mrf.mxu2 }
 0x15d   : > { %v2283_v59 = vpop.f32.mrf.mxu3  ;;  %v494_v54 = vadd.f32 %v2281_v58, %v382_v24 }
 0x15e   : > { %v2285_v60 = vpop.f32.mrf.mxu1 }
 0x15f   : > { %v601_v55 = vadd.f32 %v2283_v59, %v494_v54  ;;  %v385_v33 = vadd.f32 %v2285_v60, %v2238_v25 }
 0x162   : > { %v2287_v61 = vpop.f32.mrf.mxu0 }
 0x163   : > { %v708_v56 = vadd.f32 %v2287_v61, %v601_v55 }
 0x164   : > { %v2289_v62 = vpop.f32.mrf.mxu2 }
 0x165   : > { %v2291_v63 = vpop.f32.mrf.mxu3  ;;  %v495_v58 = vadd.f32 %v2289_v62, %v385_v33 }
 0x166   : > { %v2293_v0 = vpop.f32.mrf.mxu1 }
 0x167   : > { %v602_v59 = vadd.f32 %v2291_v63, %v495_v58  ;;  %v388_v25 = vadd.f32 %v2293_v0, %v2263_v34 }
 0x16a   : > { %v2295_v3 = vpop.f32.mrf.mxu0 }
 0x16b   : > { %v709_v60 = vadd.f32 %v2295_v3, %v602_v59 }
 0x16c   : > { %v2297_v2 = vpop.f32.mrf.mxu2 }
 0x16d   : > { %v2299_v5 = vpop.f32.mrf.mxu3  ;;  %v496_v62 = vadd.f32 %v2297_v2, %v388_v25 }
 0x16e   : > { %v786_v6 = vpop.f32.mrf.mxu1 }
 0x16f   : > { %v810_v12 = vadd.f32 %v786_v6, %v703_v9  ;;  %v603_v63 = vadd.f32 %v2299_v5, %v496_v62 }
 0x172   : > { %v2301_v10 = vpop.f32.mrf.mxu0 }
 0x173   : > { %v710_v34 = vadd.f32 %v2301_v10, %v603_v63 }
 0x174   : > { %v893_v13 = vpop.f32.mrf.mxu2 }
 0x175   : > { %v917_v14 = vadd.f32 %v893_v13, %v810_v12  ;;  %v1000_v15 = vpop.f32.mrf.mxu3 }
 0x176   : > { %v789_v16 = vpop.f32.mrf.mxu1 }
 0x177   : > { %v1024_v21 = vadd.f32 %v1000_v15, %v917_v14  ;;  %v811_v28 = vadd.f32 %v789_v16, %v704_v20 }
 0x17a   : > { %v1107_v22 = vpop.f32.mrf.mxu0 }
 0x17b   : > { %v1131_v29 = vadd.f32 %v1107_v22, %v1024_v21 }
 0x17c   : > { %v896_v30 = vpop.f32.mrf.mxu2 }
 0x17d   : > { %v1179_v31 = vadd.f32 %v1142_v23, %v1131_v29  ;;  %v918_v32 = vadd.f32 %v896_v30, %v811_v28  ;;  %v1003_v35 = vpop.f32.mrf.mxu3 }
 0x17e   : > { %v792_v36 = vpop.f32.mrf.mxu1 }
 0x17f   : > { %1187 = vst [vmem:[%s2305_s4] sm:$0xff] %v1179_v31  ;;  %v1025_v39 = vadd.f32 %v1003_v35, %v918_v32  ;;  %v812_v43 = vadd.f32 %v792_v36, %v705_v38  ;;  %v1162_v31 = vpop.permute.xlu1 %1161 }
 0x182   : > { %v1110_v40 = vpop.f32.mrf.mxu0 }
 0x183   : > { %v1132_v44 = vadd.f32 %v1110_v40, %v1025_v39 }
 0x184   : > { %v899_v45 = vpop.f32.mrf.mxu2 }
 0x185   : > { %v1180_v46 = vadd.f32 %v1147_v41, %v1132_v44  ;;  %v919_v1 = vadd.f32 %v899_v45, %v812_v43  ;;  %v1006_v4 = vpop.f32.mrf.mxu3  ;;  %v1167_v41 = vpop.permute.xlu2 %1166 }
 0x186   : > { %v795_v6 = vpop.f32.mrf.mxu1  ;;  %v1248_v10 = vld [vmem:[%s2305_s4] sm:$0xff] (%p1861_p5) }
 0x187   : > { %1188 = vst [vmem:[%s2305_s4 + $0x8] sm:$0xff] %v1180_v46  ;;  %v1026_v48 = vadd.f32 %v1006_v4, %v919_v1  ;;  %v813_v9 = vadd.f32 %v795_v6, %v706_v27  ;;  %v1172_v6 = vpop.permute.xlu0 %1171 }
 0x188   : > { %1249 = vst [vmem:[%s1205_s23] sm:$0xff] (%p1861_p5), %v1248_v10 }
 0x18a   : > { %v1113_v49 = vpop.f32.mrf.mxu0 }
 0x18b   : > { %v1133_v11 = vadd.f32 %v1113_v49, %v1026_v48 }
 0x18c   : > { %v902_v12 = vpop.f32.mrf.mxu2 }
 0x18d   : > { %v1181_v13 = vadd.f32 %v1152_v8, %v1133_v11  ;;  %v920_v14 = vadd.f32 %v902_v12, %v813_v9  ;;  %v1009_v15 = vpop.f32.mrf.mxu3  ;;  %v1177_v11 = vpop.permute.xlu1 %1176 }
 0x18e   : > { %v798_v16 = vpop.f32.mrf.mxu1  ;;  %v1250_v12 = vld [vmem:[%s2305_s4 + $0x8] sm:$0xff] (%p1861_p5) }
 0x18f   : > { %1189 = vst [vmem:[%s2305_s4 + $0x10] sm:$0xff] %v1181_v13  ;;  %v1027_v53 = vadd.f32 %v1009_v15, %v920_v14  ;;  %v814_v20 = vadd.f32 %v798_v16, %v707_v52 }
 0x190   : > { %1251 = vst [vmem:[%s1205_s23 + $0x18] sm:$0xff] (%p1861_p5), %v1250_v12 }
 0x192   : > { %v1116_v17 = vpop.f32.mrf.mxu0 }
 0x193   : > { %v1134_v21 = vadd.f32 %v1116_v17, %v1027_v53 }
 0x194   : > { %v905_v22 = vpop.f32.mrf.mxu2 }
 0x195   : > { %v1182_v23 = vadd.f32 %v1157_v18, %v1134_v21  ;;  %v921_v26 = vadd.f32 %v905_v22, %v814_v20  ;;  %v1012_v28 = vpop.f32.mrf.mxu3 }
 0x196   : > { %v801_v29 = vpop.f32.mrf.mxu1  ;;  %v1252_v13 = vld [vmem:[%s2305_s4 + $0x10] sm:$0xff] (%p1861_p5) }
 0x197   : > { %1190 = vst [vmem:[%s2305_s4 + $0x18] sm:$0xff] %v1182_v23  ;;  %v1028_v57 = vadd.f32 %v1012_v28, %v921_v26  ;;  %v815_v32 = vadd.f32 %v801_v29, %v708_v56 }
 0x198   : > { %1253 = vst [vmem:[%s1205_s23 + $0x30] sm:$0xff] (%p1861_p5), %v1252_v13 }
 0x19a   : > { %v1119_v30 = vpop.f32.mrf.mxu0 }
 0x19b   : > { %v1135_v35 = vadd.f32 %v1119_v30, %v1028_v57 }
 0x19c   : > { %v908_v36 = vpop.f32.mrf.mxu2 }
 0x19d   : > { %v1183_v37 = vadd.f32 %v1162_v31, %v1135_v35  ;;  %v922_v19 = vadd.f32 %v908_v36, %v815_v32  ;;  %v1015_v38 = vpop.f32.mrf.mxu3 }
 0x19e   : > { %v804_v39 = vpop.f32.mrf.mxu1  ;;  %v1254_v14 = vld [vmem:[%s2305_s4 + $0x18] sm:$0xff] (%p1861_p5) }
 0x19f   : > { %1191 = vst [vmem:[%s2305_s4 + $0x20] sm:$0xff] %v1183_v37  ;;  %v1029_v61 = vadd.f32 %v1015_v38, %v922_v19  ;;  %v816_v42 = vadd.f32 %v804_v39, %v709_v60 }
 0x1a0   : > { %1255 = vst [vmem:[%s1205_s23 + $0x48] sm:$0xff] (%p1861_p5), %v1254_v14 }
 0x1a2   : > { %v1122_v40 = vpop.f32.mrf.mxu0 }
 0x1a3   : > { %v1136_v43 = vadd.f32 %v1122_v40, %v1029_v61 }
 0x1a4   : > { %v911_v44 = vpop.f32.mrf.mxu2 }
 0x1a5   : > { %v1184_v45 = vadd.f32 %v1167_v41, %v1136_v43  ;;  %v923_v46 = vadd.f32 %v911_v44, %v816_v42  ;;  %v1018_v1 = vpop.f32.mrf.mxu3 }
 0x1a6   : > { %v807_v4 = vpop.f32.mrf.mxu1  ;;  %v1256_v15 = vld [vmem:[%s2305_s4 + $0x20] sm:$0xff] (%p1861_p5) }
 0x1a7   : > { %1192 = vst [vmem:[%s2305_s4 + $0x28] sm:$0xff] %v1184_v45  ;;  %v1030_v0 = vadd.f32 %v1018_v1, %v923_v46  ;;  %v817_v47 = vadd.f32 %v807_v4, %v710_v34 }
 0x1a8   : > { %1257 = vst [vmem:[%s1205_s23 + $0x60] sm:$0xff] (%p1861_p5), %v1256_v15 }
 0x1aa   : > { %v1125_v3 = vpop.f32.mrf.mxu0 }
 0x1ab   : > { %v1137_v7 = vadd.f32 %v1125_v3, %v1030_v0 }
 0x1ac   : > { %v914_v2 = vpop.f32.mrf.mxu2 }
 0x1ad   : > { %v1185_v27 = vadd.f32 %v1172_v6, %v1137_v7  ;;  %v924_v48 = vadd.f32 %v914_v2, %v817_v47  ;;  %v1021_v49 = vpop.f32.mrf.mxu3 }
 0x1ae   : > { %v1258_v16 = vld [vmem:[%s2305_s4 + $0x28] sm:$0xff] (%p1861_p5) }
 0x1af   : > { %1193 = vst [vmem:[%s2305_s4 + $0x30] sm:$0xff] %v1185_v27  ;;  %v1031_v8 = vadd.f32 %v1021_v49, %v924_v48 }
 0x1b0   : > { %1259 = vst [vmem:[%s1205_s23 + $0x78] sm:$0xff] (%p1861_p5), %v1258_v16 }
 0x1b2   : > { %v1128_v50 = vpop.f32.mrf.mxu0 }
 0x1b3   : > { %v1138_v9 = vadd.f32 %v1128_v50, %v1031_v8  ;;  %1201 = sbr.rel (!%p1861_p5) target bundleno = 448 (0x1c0), region = 36 }
 0x1b5   : > { %v1186_v5 = vadd.f32 %v1177_v11, %v1138_v9 }
 0x1b6   : > { %v1260_v51 = vld [vmem:[%s2305_s4 + $0x30] sm:$0xff] (%p1861_p5) }
 0x1b7   : > { %1194 = vst [vmem:[%s2305_s4 + $0x38] sm:$0xff] %v1186_v5 }
 0x1b8   : > { %1261 = vst [vmem:[%s1205_s23 + $0x90] sm:$0xff] %v1260_v51 }
 0x1be   : > { %v1262_v24 = vld [vmem:[%s2305_s4 + $0x38] sm:$0xff] }
 0x1bf   : > { %1263 = vst [vmem:[%s1205_s23 + $0xa8] sm:$0xff] %v1262_v24 }
 0x1c0 PF: > { %s13_s18 = sadd.s32 1, %s1784_s18   ;;  %s2378_s12 = smov %s1764_s13 }
 0x1c1   : > { %p10_p11 = scmp.ge.s32.totalorder %s13_s18, 8   ;;  %s2379_s13 = smov %s1872_s27 }
 0x1c2   : > { %s2380_s14 = smov %s1776_s16  ;;  %s2381_s15 = smov %s1780_s17 }
 0x1c3   : > { %s2382_s16 = smov %s2385_s19  ;;  %s2383_s17 = smov %s2389_s20 }
 0x1c4   :  { %12 = sbr.rel (!%p10_p11) target bundleno = 4 (0x4), region = 108 }

</bundles_post_ra>
